<compile_context>
chip_gen: v5e
topology: v5e:2x2
jax: 0.10.0
libtpu: 0.0.40
codegen_flags: <defaults>
</compile_context>

<pallas_src>
import functools

import jax
import jax.numpy as jnp
from jax import lax
from jax.experimental import pallas as pl
from jax.experimental.pallas import tpu as pltpu


def _sag_kernel(x_ref, wqk_ref, bqk_ref, mask_ref, gamma_ref, o_ref,
                q_scr, k_scr, *, cq, ti, use_bf16_exp, apply_mask):
    i = pl.program_id(1)

    # ---- once per batch element: fused q/k projection, cached in bf16 ----
    @pl.when(i == 0)
    def _project():
        x_full = x_ref[0]                                            # (C, HWp) f32
        qk = jnp.dot(wqk_ref[...], x_full,
                     preferred_element_type=jnp.float32) + bqk_ref[...]   # (2Cq, HWp)
        q_scr[...] = qk[:cq].astype(jnp.bfloat16)                    # (Cq, HWp)
        k_scr[...] = qk[cq:].astype(jnp.bfloat16)                    # (Cq, HWp)

    # ---- this step's query-row tile ----
    start = i * ti
    if ti % 128 == 0:
        start = pl.multiple_of(start, 128)

    q_tile = q_scr[:, pl.ds(start, ti)]                              # (Cq, Ti) bf16
    k = k_scr[...]                                                   # (Cq, HWp) bf16

    # energy[r, j] = sum_c q_tile[c, r] * k[c, j]   (f32 accumulation)
    energy = lax.dot_general(
        q_tile, k, dimension_numbers=(((0,), (0,)), ((), ())),
        preferred_element_type=jnp.float32)                          # (Ti, HWp) f32
    if apply_mask:
        energy = energy + mask_ref[...]      # -1e30 on padded key columns

    # ---- row-wise softmax; normalization is folded into the (C,Ti) operand ----
    m = jnp.max(energy, axis=-1, keepdims=True)
    if use_bf16_exp:
        # bf16 EUP path (v6e / v7x): ~2x exp throughput; bf16 MXU cast is free.
        p = jnp.exp((energy - m).astype(jnp.bfloat16))               # (Ti, HWp) bf16
        denom = jnp.sum(p, axis=-1, keepdims=True, dtype=jnp.float32)
        p_mm = p
    else:
        # v5e has no bf16 VPU/EUP: keep f32 softmax math.
        p = jnp.exp(energy - m)                                      # (Ti, HWp) f32
        denom = jnp.sum(p, axis=-1, keepdims=True)
        p_mm = p.astype(jnp.bfloat16)
    inv = pl.reciprocal(denom, approx=True)                          # (Ti, 1) f32

    # out[c, j] += sum_i x[c, i] * inv[i] * p[i, j]   (bf16 MXU, f32 acc)
    x_tile = x_ref[0, :, pl.ds(start, ti)]                           # (C, Ti) f32
    x_scaled = (x_tile * inv.reshape(1, ti)).astype(jnp.bfloat16)    # (C, Ti) bf16
    contrib = jnp.dot(x_scaled, p_mm,
                      preferred_element_type=jnp.float32)            # (C, HWp) f32

    # Accumulate directly into the VMEM-resident output block (no scratch,
    # no zero-fill: first step stores, later steps add).
    @pl.when(i == 0)
    def _store_first():
        o_ref[0] = contrib

    @pl.when(i > 0)
    def _accumulate():
        o_ref[0] += contrib

    # ---- finalize: gamma scale + residual add ----
    @pl.when(i == pl.num_programs(1) - 1)
    def _finalize():
        o_ref[0] = gamma_ref[0] * o_ref[0] + x_ref[0]


def _vmem_capacity_bytes():
    try:
        return int(pltpu.get_tpu_info().vmem_capacity_bytes)
    except Exception:
        return 64 * 1024 * 1024   # safe default for any generation


def _bf16_exp_supported():
    # bf16 VPU/EUP exists on v6e and newer; v5e (and older) lack it.
    try:
        kind = jax.devices()[0].device_kind.lower()
    except Exception:
        return False
    return any(tag in kind for tag in ("v6", "v7", "7x"))


def _vmem_estimate_bytes(C, HWp, Cq, ti):
    x_blocks = 2 * C * HWp * 4      # x input block, double-buffered (f32)
    o_blocks = 2 * C * HWp * 4      # output block, double-buffered (f32)
    qk_scr = 2 * Cq * HWp * 2       # q/k bf16 caches
    softmax = 4 * ti * HWp * 4      # energy / exp temporaries (f32)
    return x_blocks + o_blocks + qk_scr + softmax + (2 << 20)


def _pick_tile_and_vmem_limit(C, HWp, Cq):
    """Largest query tile (multiple of 128 dividing HWp) that fits the chip's VMEM."""
    cap = _vmem_capacity_bytes()
    budget = int(cap * 0.8)          # headroom for Mosaic internals
    candidates = [t for t in (512, 384, 256, 128) if HWp % t == 0]  # never empty
    ti = candidates[-1]
    for t in candidates:             # largest first
        if _vmem_estimate_bytes(C, HWp, Cq, t) <= budget:
            ti = t
            break
    est = _vmem_estimate_bytes(C, HWp, Cq, ti)
    vmem_limit = int(min(max(2 * est, 48 * 1024 * 1024), budget))
    return ti, vmem_limit


@functools.partial(jax.jit, static_argnames=("H", "W"))
def spatial_attention_gate(x, wq, bq, wk, bk, gamma, *, H, W):
    """x: (B, C, H, W). Returns gamma * (x @ softmax(q^T k)) + x, shape (B, C, H, W)."""
    B, C, Hx, Wx = x.shape
    assert (Hx, Wx) == (H, W)
    Cq = wq.shape[0]
    HW = H * W
    HWp = ((HW + 127) // 128) * 128          # lane-dense spatial dim
    pad = HWp - HW

    orig_dtype = x.dtype
    xf = x.astype(jnp.float32).reshape(B, C, HW)
    if pad:
        xf = jnp.pad(xf, ((0, 0), (0, 0), (0, pad)))

    # Additive mask: 0 on valid key columns, -1e30 on padded ones.
    col = jnp.arange(HWp, dtype=jnp.int32)
    mask = jnp.where(col < HW, 0.0, -1e30).astype(jnp.float32).reshape(1, HWp)

    # Fuse query/key 1x1 convs into one weight / bias.
    w_qk = jnp.concatenate([wq, wk], axis=0).astype(jnp.float32)
    b_qk = jnp.concatenate([bq, bk], axis=0).reshape(2 * Cq, 1).astype(jnp.float32)
    gamma_s = gamma.reshape(1).astype(jnp.float32)

    Ti, vmem_limit = _pick_tile_and_vmem_limit(C, HWp, Cq)
    NI = HWp // Ti
    use_bf16_exp = _bf16_exp_supported()

    kernel = functools.partial(_sag_kernel, cq=Cq, ti=Ti,
                               use_bf16_exp=use_bf16_exp,
                               apply_mask=pad > 0)

    out_flat = pl.pallas_call(
        kernel,
        out_shape=jax.ShapeDtypeStruct((B, C, HWp), jnp.float32),
        grid_spec=pltpu.PrefetchScalarGridSpec(
            num_scalar_prefetch=0,
            grid=(B, NI),
            in_specs=[
                pl.BlockSpec((1, C, HWp), lambda b, i: (b, 0, 0)),      # x
                pl.BlockSpec((2 * Cq, C), lambda b, i: (0, 0)),         # w_qk
                pl.BlockSpec((2 * Cq, 1), lambda b, i: (0, 0)),         # b_qk
                pl.BlockSpec((1, HWp), lambda b, i: (0, 0)),            # pad mask
                pl.BlockSpec(memory_space=pltpu.MemorySpace.SMEM),      # gamma
            ],
            out_specs=pl.BlockSpec((1, C, HWp), lambda b, i: (b, 0, 0)),
            scratch_shapes=[
                pltpu.VMEM((Cq, HWp), jnp.bfloat16),   # q (projected, cached)
                pltpu.VMEM((Cq, HWp), jnp.bfloat16),   # k (projected, cached)
            ],
        ),
        # Output reuses x's HBM buffer: x[b] is fully resident in VMEM before
        # out[b] is ever written back, so there is no hazard.
        input_output_aliases={0: 0},
        compiler_params=pltpu.CompilerParams(
            dimension_semantics=("parallel", "arbitrary"),
            vmem_limit_bytes=vmem_limit),
    )(xf, w_qk, b_qk, mask, gamma_s)

    out = out_flat[:, :, :HW].reshape(B, C, H, W)
    return out.astype(orig_dtype)


def _reference(x, wq, bq, wk, bk, gamma):
    B, C, H, W = x.shape
    HW = H * W
    xf = x.reshape(B, C, HW).astype(jnp.float32)
    q = jnp.einsum("oc,bci->boi", wq, xf) + bq[None, :, None]
    k = jnp.einsum("oc,bci->boi", wk, xf) + bk[None, :, None]
    energy = jnp.einsum("boi,boj->bij", q, k)
    attn = jax.nn.softmax(energy, axis=-1)
    out = jnp.einsum("bci,bij->bcj", xf, attn)
    return (gamma[0] * out + xf).reshape(B, C, H, W).astype(x.dtype)


if __name__ == "__main__":
    def _run_case(B, C, H, W, case):
        Cq = C // 8
        key = jax.random.fold_in(jax.random.PRNGKey(0), case)
        kx, kwq, kbq, kwk, kbk = jax.random.split(key, 5)

        x = jax.random.normal(kx, (B, C, H, W), dtype=jnp.float32)
        # Conv2d(C, C//8, 1) weights: (C//8, C, 1, 1) squeezed to (C//8, C)
        wq = 0.1 * jax.random.normal(kwq, (Cq, C), dtype=jnp.float32)
        bq = 0.1 * jax.random.normal(kbq, (Cq,), dtype=jnp.float32)
        wk = 0.1 * jax.random.normal(kwk, (Cq, C), dtype=jnp.float32)
        bk = 0.1 * jax.random.normal(kbk, (Cq,), dtype=jnp.float32)
        # Module initializes gamma to zeros(1); use a nonzero deterministic
        # value so the attention path actually contributes to the output.
        gamma = jnp.array([0.5], dtype=jnp.float32)

        out = spatial_attention_gate(x, wq, bq, wk, bk, gamma, H=H, W=W)
        out = jax.block_until_ready(out)
        ref = _reference(x, wq, bq, wk, bk, gamma)
        assert out.shape == (B, C, H, W)
        # bf16 MXU operands (+ bf16 exp on v6e+, approx reciprocal) -> loose tol.
        err = float(jnp.max(jnp.abs(out - ref)))
        assert jnp.allclose(out, ref, atol=3e-2, rtol=3e-2), (
            f"case {case}: mismatch vs reference (max abs err {err:.5f})")

    _run_case(2, 16, 16, 16, case=0)   # lane-aligned HW=256, single i-step
    _run_case(1, 16, 24, 24, case=1)   # HW=576 -> padded to 640, multi-step + mask
    print("KERNEL_OK")
</pallas_src>

<mosaic_0001>
module attributes {stable_mosaic.version = 11 : i64} {
  func.func @_sag_kernel(%arg0: i32, %arg1: i32, %arg2: memref<1x16x256xf32, #tpu.memory_space<vmem>>, %arg3: memref<4x16xf32, #tpu.memory_space<vmem>>, %arg4: memref<4x1xf32, #tpu.memory_space<vmem>>, %arg5: memref<1x256xf32, #tpu.memory_space<vmem>>, %arg6: memref<1xf32, #tpu.memory_space<smem>>, %arg7: memref<1x16x256xf32, #tpu.memory_space<vmem>>, %arg8: memref<2x256xbf16, #tpu.memory_space<vmem>>, %arg9: memref<2x256xbf16, #tpu.memory_space<vmem>>) attributes {dimension_semantics = [#tpu.dimension_semantics<parallel>, #tpu.dimension_semantics<arbitrary>], iteration_bounds = array<i64: 2, 1>, scalar_prefetch = 0 : i64, scratch_operands = 2 : i64, tpu.core_type = #tpu.core_type<tc>, window_params = [{transform_indices = @transform_0, window_bounds = array<i64: 1, 16, 256>}, {pipeline_mode = #tpu.pipeline_mode<synchronous>, transform_indices = @transform_1, window_bounds = array<i64: 4, 16>}, {pipeline_mode = #tpu.pipeline_mode<synchronous>, transform_indices = @transform_2, window_bounds = array<i64: 4, 1>}, {pipeline_mode = #tpu.pipeline_mode<synchronous>, transform_indices = @transform_3, window_bounds = array<i64: 1, 256>}, {transform_indices = @transform_4, window_bounds = array<i64: 1>}, {transform_indices = @transform_5, window_bounds = array<i64: 1, 16, 256>}]} {
    %c0_i32 = arith.constant 0 : i32
    %0 = arith.cmpi eq, %arg1, %c0_i32 : i32
    %1 = arith.extui %0 : i1 to i32
    %c0_i32_0 = arith.constant 0 : i32
    %2 = arith.cmpi ne, %1, %c0_i32_0 : i32
    scf.if %2 {
      %c0_14 = arith.constant 0 : index
      %c0_15 = arith.constant 0 : index
      %c0_16 = arith.constant 0 : index
      %35 = vector.load %arg2[%c0_14, %c0_15, %c0_16] : memref<1x16x256xf32, #tpu.memory_space<vmem>>, vector<1x16x256xf32>
      %36 = vector.shape_cast %35 : vector<1x16x256xf32> to vector<16x256xf32>
      %c0_17 = arith.constant 0 : index
      %c0_18 = arith.constant 0 : index
      %37 = vector.load %arg3[%c0_17, %c0_18] : memref<4x16xf32, #tpu.memory_space<vmem>>, vector<4x16xf32>
      %cst_19 = arith.constant dense<0.000000e+00> : vector<4x256xf32>
      %38 = tpu.matmul %37, %36, %cst_19 {dimension_numbers = #tpu.dot_dimension_numbers<[1], [0], [0], [1], [0, 0, 1, 1], [], []>} : vector<4x16xf32>, vector<16x256xf32>, vector<4x256xf32> -> vector<4x256xf32>
      %c0_20 = arith.constant 0 : index
      %c0_21 = arith.constant 0 : index
      %39 = vector.load %arg4[%c0_20, %c0_21] : memref<4x1xf32, #tpu.memory_space<vmem>>, vector<4x1xf32>
      %40 = vector.broadcast %39 : vector<4x1xf32> to vector<4x256xf32>
      %41 = arith.addf %38, %40 : vector<4x256xf32>
      %42 = vector.extract_strided_slice %41 {offsets = [0, 0], sizes = [2, 256], strides = [1, 1]} : vector<4x256xf32> to vector<2x256xf32>
      %43 = arith.truncf %42 : vector<2x256xf32> to vector<2x256xbf16>
      %c0_22 = arith.constant 0 : index
      %c0_23 = arith.constant 0 : index
      %44 = vector.load %arg8[%c0_22, %c0_23] : memref<2x256xbf16, #tpu.memory_space<vmem>>, vector<2x256xbf16>
      tpu.vector_store %arg8[%c0_22, %c0_23], %43 {strides = array<i32>} : memref<2x256xbf16, #tpu.memory_space<vmem>>, vector<2x256xbf16>,
      %45 = vector.extract_strided_slice %41 {offsets = [2, 0], sizes = [2, 256], strides = [1, 1]} : vector<4x256xf32> to vector<2x256xf32>
      %46 = arith.truncf %45 : vector<2x256xf32> to vector<2x256xbf16>
      %c0_24 = arith.constant 0 : index
      %c0_25 = arith.constant 0 : index
      %47 = vector.load %arg9[%c0_24, %c0_25] : memref<2x256xbf16, #tpu.memory_space<vmem>>, vector<2x256xbf16>
      tpu.vector_store %arg9[%c0_24, %c0_25], %46 {strides = array<i32>} : memref<2x256xbf16, #tpu.memory_space<vmem>>, vector<2x256xbf16>,
    } else {
    }
    %c256_i32 = arith.constant 256 : i32
    %3 = arith.muli %arg1, %c256_i32 : i32
    %4 = tpu.assume_multiple %3, 128 : i32
    %c0 = arith.constant 0 : index
    %5 = arith.index_cast %4 : i32 to index
    %6 = vector.load %arg8[%c0, %5] : memref<2x256xbf16, #tpu.memory_space<vmem>>, vector<2x256xbf16>
    %c0_1 = arith.constant 0 : index
    %c0_2 = arith.constant 0 : index
    %7 = vector.load %arg9[%c0_1, %c0_2] : memref<2x256xbf16, #tpu.memory_space<vmem>>, vector<2x256xbf16>
    %cst = arith.constant dense<0.000000e+00> : vector<256x256xf32>
    %8 = tpu.matmul %6, %7, %cst {dimension_numbers = #tpu.dot_dimension_numbers<[0], [0], [1], [1], [0, 1, 1, 1], [], []>} : vector<2x256xbf16>, vector<2x256xbf16>, vector<256x256xf32> -> vector<256x256xf32>
    %cst_3 = arith.constant dense<0xFF800000> : vector<256xf32>
    %9 = vector.multi_reduction <maximumf>, %8, %cst_3 [1] : vector<256x256xf32> to vector<256xf32>
    %10 = vector.shape_cast %9 : vector<256xf32> to vector<256x1xf32>
    %11 = vector.broadcast %10 : vector<256x1xf32> to vector<256x256xf32>
    %12 = arith.subf %8, %11 : vector<256x256xf32>
    %13 = math.exp %12 : vector<256x256xf32>
    %cst_4 = arith.constant dense<0.000000e+00> : vector<256xf32>
    %14 = vector.multi_reduction <add>, %13, %cst_4 [1] : vector<256x256xf32> to vector<256xf32>
    %15 = vector.shape_cast %14 : vector<256xf32> to vector<256x1xf32>
    %16 = arith.truncf %13 : vector<256x256xf32> to vector<256x256xbf16>
    %17 = tpu.reciprocal %15 {approx = true} : vector<256x1xf32> -> vector<256x1xf32>
    %c0_5 = arith.constant 0 : index
    %c0_6 = arith.constant 0 : index
    %18 = arith.index_cast %4 : i32 to index
    %19 = vector.load %arg2[%c0_5, %c0_6, %18] : memref<1x16x256xf32, #tpu.memory_space<vmem>>, vector<1x16x256xf32>
    %20 = vector.shape_cast %19 : vector<1x16x256xf32> to vector<16x256xf32>
    %21 = vector.shape_cast %17 : vector<256x1xf32> to vector<1x256xf32>
    %22 = vector.broadcast %21 : vector<1x256xf32> to vector<16x256xf32>
    %23 = arith.mulf %20, %22 : vector<16x256xf32>
    %24 = arith.truncf %23 : vector<16x256xf32> to vector<16x256xbf16>
    %cst_7 = arith.constant dense<0.000000e+00> : vector<16x256xf32>
    %25 = tpu.matmul %24, %16, %cst_7 {dimension_numbers = #tpu.dot_dimension_numbers<[1], [0], [0], [1], [0, 0, 1, 1], [], []>} : vector<16x256xbf16>, vector<256x256xbf16>, vector<16x256xf32> -> vector<16x256xf32>
    %c0_i32_8 = arith.constant 0 : i32
    %26 = arith.cmpi eq, %arg1, %c0_i32_8 : i32
    %27 = arith.extui %26 : i1 to i32
    %c0_i32_9 = arith.constant 0 : i32
    %28 = arith.cmpi ne, %27, %c0_i32_9 : i32
    scf.if %28 {
      %c0_14 = arith.constant 0 : index
      %c0_15 = arith.constant 0 : index
      %c0_16 = arith.constant 0 : index
      %35 = vector.load %arg7[%c0_14, %c0_15, %c0_16] : memref<1x16x256xf32, #tpu.memory_space<vmem>>, vector<1x16x256xf32>
      %36 = vector.shape_cast %35 : vector<1x16x256xf32> to vector<16x256xf32>
      %37 = vector.shape_cast %25 : vector<16x256xf32> to vector<1x16x256xf32>
      tpu.vector_store %arg7[%c0_14, %c0_15, %c0_16], %37 {strides = array<i32>} : memref<1x16x256xf32, #tpu.memory_space<vmem>>, vector<1x16x256xf32>,
    } else {
    }
    %c0_i32_10 = arith.constant 0 : i32
    %29 = arith.cmpi sgt, %arg1, %c0_i32_10 : i32
    %30 = arith.extui %29 : i1 to i32
    %c0_i32_11 = arith.constant 0 : i32
    %31 = arith.cmpi ne, %30, %c0_i32_11 : i32
    scf.if %31 {
      %c0_14 = arith.constant 0 : index
      %c0_15 = arith.constant 0 : index
      %c0_16 = arith.constant 0 : index
      %35 = vector.load %arg7[%c0_14, %c0_15, %c0_16] : memref<1x16x256xf32, #tpu.memory_space<vmem>>, vector<1x16x256xf32>
      %36 = vector.shape_cast %35 : vector<1x16x256xf32> to vector<16x256xf32>
      %37 = arith.addf %36, %25 : vector<16x256xf32>
      %c0_17 = arith.constant 0 : index
      %c0_18 = arith.constant 0 : index
      %c0_19 = arith.constant 0 : index
      %38 = vector.load %arg7[%c0_17, %c0_18, %c0_19] : memref<1x16x256xf32, #tpu.memory_space<vmem>>, vector<1x16x256xf32>
      %39 = vector.shape_cast %38 : vector<1x16x256xf32> to vector<16x256xf32>
      %40 = vector.shape_cast %37 : vector<16x256xf32> to vector<1x16x256xf32>
      tpu.vector_store %arg7[%c0_17, %c0_18, %c0_19], %40 {strides = array<i32>} : memref<1x16x256xf32, #tpu.memory_space<vmem>>, vector<1x16x256xf32>,
    } else {
    }
    %c0_i32_12 = arith.constant 0 : i32
    %32 = arith.cmpi eq, %arg1, %c0_i32_12 : i32
    %33 = arith.extui %32 : i1 to i32
    %c0_i32_13 = arith.constant 0 : i32
    %34 = arith.cmpi ne, %33, %c0_i32_13 : i32
    scf.if %34 {
      %c0_14 = arith.constant 0 : index
      %35 = memref.load %arg6[%c0_14] : memref<1xf32, #tpu.memory_space<smem>>
      %c0_15 = arith.constant 0 : index
      %c0_16 = arith.constant 0 : index
      %c0_17 = arith.constant 0 : index
      %36 = vector.load %arg7[%c0_15, %c0_16, %c0_17] : memref<1x16x256xf32, #tpu.memory_space<vmem>>, vector<1x16x256xf32>
      %37 = vector.shape_cast %36 : vector<1x16x256xf32> to vector<16x256xf32>
      %38 = vector.broadcast %35 : f32 to vector<16x256xf32>
      %39 = arith.mulf %38, %37 : vector<16x256xf32>
      %c0_18 = arith.constant 0 : index
      %c0_19 = arith.constant 0 : index
      %c0_20 = arith.constant 0 : index
      %40 = vector.load %arg2[%c0_18, %c0_19, %c0_20] : memref<1x16x256xf32, #tpu.memory_space<vmem>>, vector<1x16x256xf32>
      %41 = vector.shape_cast %40 : vector<1x16x256xf32> to vector<16x256xf32>
      %42 = arith.addf %39, %41 : vector<16x256xf32>
      %c0_21 = arith.constant 0 : index
      %c0_22 = arith.constant 0 : index
      %c0_23 = arith.constant 0 : index
      %43 = vector.load %arg7[%c0_21, %c0_22, %c0_23] : memref<1x16x256xf32, #tpu.memory_space<vmem>>, vector<1x16x256xf32>
      %44 = vector.shape_cast %43 : vector<1x16x256xf32> to vector<16x256xf32>
      %45 = vector.shape_cast %42 : vector<16x256xf32> to vector<1x16x256xf32>
      tpu.vector_store %arg7[%c0_21, %c0_22, %c0_23], %45 {strides = array<i32>} : memref<1x16x256xf32, #tpu.memory_space<vmem>>, vector<1x16x256xf32>,
    } else {
    }
    return
  }
  func.func @transform_0(%arg0: i32, %arg1: i32) -> (i32, i32, i32) {
    %c0_i32 = arith.constant 0 : i32
    %c0_i32_0 = arith.constant 0 : i32
    %c0_i32_1 = arith.constant 0 : i32
    return %arg0, %c0_i32, %c0_i32_0 : i32, i32, i32
  }
  func.func @transform_1(%arg0: i32, %arg1: i32) -> (i32, i32) {
    %c0_i32 = arith.constant 0 : i32
    %c0_i32_0 = arith.constant 0 : i32
    %c0_i32_1 = arith.constant 0 : i32
    return %c0_i32, %c0_i32_0 : i32, i32
  }
  func.func @transform_2(%arg0: i32, %arg1: i32) -> (i32, i32) {
    %c0_i32 = arith.constant 0 : i32
    %c0_i32_0 = arith.constant 0 : i32
    %c0_i32_1 = arith.constant 0 : i32
    return %c0_i32, %c0_i32_0 : i32, i32
  }
  func.func @transform_3(%arg0: i32, %arg1: i32) -> (i32, i32) {
    %c0_i32 = arith.constant 0 : i32
    %c0_i32_0 = arith.constant 0 : i32
    %c0_i32_1 = arith.constant 0 : i32
    return %c0_i32, %c0_i32_0 : i32, i32
  }
  func.func @transform_4(%arg0: i32, %arg1: i32) -> i32 {
    %c0_i32 = arith.constant 0 : i32
    %c0_i32_0 = arith.constant 0 : i32
    return %c0_i32 : i32
  }
  func.func @transform_5(%arg0: i32, %arg1: i32) -> (i32, i32, i32) {
    %c0_i32 = arith.constant 0 : i32
    %c0_i32_0 = arith.constant 0 : i32
    %c0_i32_1 = arith.constant 0 : i32
    return %arg0, %c0_i32, %c0_i32_0 : i32, i32, i32
  }
}

</mosaic_0001>

<bundles_post_ra>
// kernel: spatial_attention_gate.1
= control target key start
LH: loop header
LB: loop body
LE: loop exit
PB: predicated region body
PF: predicated region fallthrough
CT: control target
= control target key end

     0   :  { %s1685_s20 = smov 0   ;;  %s1687_s21 = smov 0   ;;  %s2458_s0 = inlined_call_operand.vmem [shape: f32[2,16,256], index: 0, kind: input, shape index: {}, may-alias: {0,5}]   ;;  %s2459_s1 = inlined_call_operand.vmem [shape: f32[4,16], index: 1, kind: input, shape index: {}]   ;;  %s2460_s2 = inlined_call_operand.vmem [shape: f32[4,1], index: 2, kind: input, shape index: {}]   ;;  %s2461_s3 = inlined_call_operand.vmem [shape: f32[1,256], index: 3, kind: input, shape index: {}]   ;;  %s2462_s4 = inlined_call_operand.<no memory space> [shape: f32[1], index: 4, kind: input, shape index: {}]   ;;  %s2463_s5 = inlined_call_operand.vmem [shape: f32[2,16,256], index: 5, kind: output, shape index: {}, may-alias: {0,5}]  }
   0x1   :  { %10 = sst [smem:[#allocation4]] %s2462_s4  ;;  %s1689_s22 = smov 0  }
   0x2 LB: > { %s28_s3 = sadd.s32 1, %s1645_s21  ;;  %p1364_p0 = scmp.ge.s32.totalorder %s1649_s22, 1  ;;  %s1649_s22 = sphi %s1689_s22, %s16_s22   ;;  %s1645_s21 = sphi %s1687_s21, %s2526_s21   ;;  %s1641_s20 = sphi %s1685_s20, %s2525_s20  }
   0x3   : > { %p30_p1 = scmp.ge.s32.totalorder %s28_s3, 2  ;;  %p200_p2 = scmp.lt.s32.totalorder %s1649_s22, 3 }
   0x5   : > { %s2528_s3 = smov (%p30_p1, %s28_s3), 0  ;;  %p201_p3 = pnand %p1364_p0, %p200_p2 }
   0x7   : > { %204 = sbr.rel (%p201_p3) target bundleno = 1191 (0x4a7), region = 40 }
   0xc   : > { %p228_p4 = scmp.lt.s32.totalorder %s1641_s20, 1  ;;  %v1651_v0 = vmov 0   ;;  %v248_v1 = vld [vmem:[%s2460_s2] sm:$0xf]  ;;  %vm254_vm0 = vcmask 130048   ;;  %vm301_vm1 = vcmask 1040384  }
   0xd   : > { %1434 = vset.pattern.permute.xlu0 %v1651_v0  ;;  %v247_v6 = vld [vmem:[%s2459_s1] sm:$0xf]  ;;  %vm352_vm2 = vcmask 15360   ;;  %vm1075_vm3 = vcmask 130112   ;;  %vm1079_vm4 = vcmask 195712   ;;  %vm1083_vm5 = vcmask 261312  }
   0xe   : > { %s2530_s20 = smov (!%p228_p4, %s1641_s20), 1  ;;  %251 = vperm.xlu0 %1434, %v248_v1   ;;  %vm1087_vm6 = vcmask 326912   ;;  %vm1091_vm7 = vcmask 392512   ;;  %vm1095_vm8 = vcmask 458112   ;;  %vm1099_vm9 = vcmask 523712   ;;  %s1272_s8 = sld [smem:[#allocation4]] }
   0xf   : > { %s1405_s24 = sshll.u32 %s2530_s20, 5  ;;  %vm1103_vm10 = vcmask 589312   ;;  %vm1107_vm11 = vcmask 654912   ;;  %vm1111_vm12 = vcmask 720512   ;;  %vm1115_vm13 = vcmask 786112  }
  0x10   : > { %s1714_s27 = scalar_lea.vmem %s2458_s0, %s1405_s24  ;;  %vm1119_vm14 = vcmask 851712   ;;  %vm1123_vm15 = vcmask 917312   ;;  %s2435_s7 = scalar_lea.vmem %s2463_s5, %s1405_s24 }
  0x11   : > { %v245_v2 = vld [vmem:[%s1714_s27 + $0x10] sm:$0xff]  ;;  %v246_v3 = vld [vmem:[%s1714_s27 + $0x18] sm:$0xff]  ;;  %v243_v4 = vld [vmem:[%s1714_s27] sm:$0xff] }
  0x12   : > { %272 = vmatpush.msra.mxu0 %v245_v2  ;;  %292 = vmatpush.msra.mxu1 %v246_v3  ;;  %v244_v5 = vld [vmem:[%s1714_s27 + $0x8] sm:$0xff] }
  0x14   : > { %273 = vmatpush.msra.mxu0 %v243_v4  ;;  %293 = vmatpush.msra.mxu1 %v244_v5 }
  0x15   : > { %1369 = vmatmul.msk.f32.vlgmr.msra.gmra.mxu0 %vm254_vm0, %v247_v6  ;;  %1370 = vmatmul.msk.f32.vlgmr.msra.gmra.mxu1 %vm254_vm0, %v247_v6  ;;  %vm1127_vm0 = vcmask 982912  }
  0x80   : > { %v252_v7 = vpop.permute.xlu0 %251 }
  0x92   : > { %v275_v8 = vpop.f32.mrf.mxu0  ;;  %v295_v9 = vpop.f32.mrf.mxu1 }
  0x93   : > { %v276_v10 = vadd.f32 %v275_v8, %v252_v7  ;;  %v296_v11 = vadd.f32 %v295_v9, %v252_v7 }
  0x95   : > { %v298_v12 = vpack.c.bf16 %v296_v11, %v276_v10 }
  0x97   : > { %v300_v13 = vrot.slane %v298_v12, 3  ;;  %307 = vst [vmem:[#allocation1] sm:$0xff] %v298_v12 }
  0x99   : > { %v304_v14 = vsel %vm301_vm1, %v298_v12, %v300_v13 }
  0x9a   : > { %306 = vst [vmem:[#allocation2] sm:$0x3] %v304_v14 }
  0x9e   : > { %v309_v15 = vld [vmem:[#allocation1 + $0x1] ss:$4 sm:$0xff] }
  0x9f   : > { %311 = vst [vmem:[#allocation3] sm:$0x3] %v309_v15 }
  0xa1   : > { %v316_v16 = vld [vmem:[#allocation2] sm:$0x3] }
  0xa2   : > { %319 = vst [vmem:[#allocation1] ss:$9 sm:$0xff] %v316_v16 }
  0xa6   : > { %v317_v17 = vld [vmem:[#allocation3] sm:$0x3] }
  0xa9   : > { %v320_v18 = vld [vmem:[#allocation1] sm:$0xff]  ;;  %v321_v19 = vld [vmem:[#allocation1 + $0x9] sm:$0xff] }
  0xaa   : > { %324 = vxpose.binary.xlu0.c.b16.start.end [1/2] (short) %v321_v19, %v320_v18, 128  ;;  %349 = vst [vmem:[#allocation1] ss:$9 sm:$0xff] %v317_v17 }
  0xb1   : > { %v350_v20 = vld [vmem:[#allocation1] sm:$0xff]  ;;  %v351_v21 = vld [vmem:[#allocation1 + $0x9] sm:$0xff] }
  0xb2   : > { %v402_v22 = vsel %vm301_vm1, %v350_v20, 0  ;;  %v404_v23 = vsel %vm301_vm1, %v351_v21, 0  ;;  %vm1131_vm1 = vcmask 1048512  }
  0xb3   : > { %413 = vmatpush.bf16.msrb.mxu0 %v402_v22  ;;  %1407 = vmatpush.bf16.msra.mxu2 %v402_v22 }
  0xb4   : > { %502 = vmatpush.bf16.msrb.mxu1 %v404_v23  ;;  %1408 = vmatpush.bf16.msra.mxu3 %v404_v23 }
 0x156   : > { %v332_v24 = vpop.trf.xlu0 }
 0x157   : > { %1371 = vmatmul.msk.bf16.vlgmr.msrb.gmra.mxu0 %vm352_vm2, %v332_v24  ;;  %1387 = vmatmul.msk.bf16.vlgmr.msrb.gmra.mxu1 %vm352_vm2, %v332_v24 }
 0x15e   : > { %v333_v25 = vpop.trf.xlu0 }
 0x166   : > { %v334_v26 = vpop.trf.xlu0 }
 0x167   : > { %1372 = vmatmul.msk.bf16.gmra.mxu0 %vm352_vm2, %v334_v26  ;;  %1388 = vmatmul.msk.bf16.gmra.mxu1 %vm352_vm2, %v334_v26 }
 0x16e   : > { %v335_v27 = vpop.trf.xlu0 }
 0x176   : > { %v336_v28 = vpop.trf.xlu0 }
 0x177   : > { %1373 = vmatmul.msk.bf16.gmra.mxu0 %vm352_vm2, %v336_v28  ;;  %1389 = vmatmul.msk.bf16.gmra.mxu1 %vm352_vm2, %v336_v28 }
 0x17e   : > { %v337_v29 = vpop.trf.xlu0 }
 0x186   : > { %v338_v30 = vpop.trf.xlu0 }
 0x187   : > { %1374 = vmatmul.msk.bf16.gmra.mxu0 %vm352_vm2, %v338_v30  ;;  %1390 = vmatmul.msk.bf16.gmra.mxu1 %vm352_vm2, %v338_v30 }
 0x18e   : > { %v339_v31 = vpop.trf.xlu0 }
 0x196   : > { %v340_v32 = vpop.trf.xlu0 }
 0x197   : > { %1375 = vmatmul.msk.bf16.gmra.mxu0 %vm352_vm2, %v340_v32  ;;  %1391 = vmatmul.msk.bf16.gmra.mxu1 %vm352_vm2, %v340_v32 }
 0x19e   : > { %v341_v33 = vpop.trf.xlu0 }
 0x1a6   : > { %v342_v34 = vpop.trf.xlu0 }
 0x1a7   : > { %1376 = vmatmul.msk.bf16.vlgmr.msra.gmra.mxu2 %vm352_vm2, %v342_v34  ;;  %1392 = vmatmul.msk.bf16.gmra.mxu1 %vm352_vm2, %v342_v34 }
 0x1ae   : > { %v343_v35 = vpop.trf.xlu0 }
 0x1b6   : > { %v344_v36 = vpop.trf.xlu0 }
 0x1b7   : > { %1377 = vmatmul.msk.bf16.gmra.mxu2 %vm352_vm2, %v344_v36  ;;  %1393 = vmatmul.msk.bf16.vlgmr.msra.gmra.mxu3 %vm352_vm2, %v344_v36 }
 0x1be   : > { %v1740_v37 = vpop.trf.xlu0 }
 0x1c6   : > { %v346_v38 = vpop.trf.xlu0 }
 0x1c7   : > { %1378 = vmatmul.msk.bf16.gmra.mxu2 %vm352_vm2, %v346_v38  ;;  %1394 = vmatmul.msk.bf16.gmra.mxu3 %vm352_vm2, %v346_v38 }
 0x1ce   : > { %v347_v17 = vpop.trf.xlu0 }
 0x1d4   : > { %v1744_v39 = vpop.f32.mrf.mxu0  ;;  %v1746_v40 = vpop.f32.mrf.mxu1 }
 0x1d5   : > { %v584_v41 = vmax.f32 %v1744_v39, %v1746_v40 }
 0x1d7   : > { %1379 = vmatmul.msk.bf16.gmra.mxu2 %vm352_vm2, %v333_v25  ;;  %1395 = vmatmul.msk.bf16.gmra.mxu3 %vm352_vm2, %v333_v25 }
 0x1d8   : > { %585 = vmax.xlane.f32.xlu1 %v584_v41 }
 0x1dc   : > { %v1752_v42 = vpop.f32.mrf.mxu0  ;;  %v1754_v43 = vpop.f32.mrf.mxu1 }
 0x1dd   : > { %v587_v44 = vmax.f32 %v1752_v42, %v1754_v43 }
 0x1e0   : > { %588 = vmax.xlane.f32.xlu1 %v587_v44 }
 0x1e4   : > { %v1758_v45 = vpop.f32.mrf.mxu0  ;;  %v1760_v46 = vpop.f32.mrf.mxu1 }
 0x1e5   : > { %v590_v47 = vmax.f32 %v1758_v45, %v1760_v46 }
 0x1e7   : > { %1380 = vmatmul.msk.bf16.gmra.mxu2 %vm352_vm2, %v335_v27  ;;  %1396 = vmatmul.msk.bf16.gmra.mxu3 %vm352_vm2, %v335_v27 }
 0x1e8   : > { %591 = vmax.xlane.f32.xlu1 %v590_v47 }
 0x1ec   : > { %v1766_v48 = vpop.f32.mrf.mxu0  ;;  %v1768_v49 = vpop.f32.mrf.mxu1 }
 0x1ed   : > { %v593_v50 = vmax.f32 %v1766_v48, %v1768_v49 }
 0x1f0   : > { %594 = vmax.xlane.f32.xlu1 %v593_v50 }
 0x1f4   : > { %v1772_v51 = vpop.f32.mrf.mxu0  ;;  %v1774_v52 = vpop.f32.mrf.mxu1 }
 0x1f5   : > { %v596_v53 = vmax.f32 %v1772_v51, %v1774_v52 }
 0x1f7   : > { %1381 = vmatmul.msk.bf16.gmra.mxu2 %vm352_vm2, %v337_v29  ;;  %1397 = vmatmul.msk.bf16.gmra.mxu3 %vm352_vm2, %v337_v29 }
 0x1f8   : > { %597 = vmax.xlane.f32.xlu1 %v596_v53 }
 0x1fc   : > { %v1780_v54 = vpop.f32.mrf.mxu0  ;;  %v1782_v55 = vpop.f32.mrf.mxu1 }
 0x1fd   : > { %v599_v56 = vmax.f32 %v1780_v54, %v1782_v55 }
 0x200   : > { %600 = vmax.xlane.f32.xlu1 %v599_v56 }
 0x204   : > { %v1786_v57 = vpop.f32.mrf.mxu0  ;;  %v1788_v58 = vpop.f32.mrf.mxu1 }
 0x205   : > { %v602_v59 = vmax.f32 %v1786_v57, %v1788_v58 }
 0x207   : > { %1382 = vmatmul.msk.bf16.gmra.mxu2 %vm352_vm2, %v339_v31  ;;  %1398 = vmatmul.msk.bf16.gmra.mxu3 %vm352_vm2, %v339_v31 }
 0x208   : > { %603 = vmax.xlane.f32.xlu0 %v602_v59 }
 0x20c   : > { %v1794_v60 = vpop.f32.mrf.mxu0  ;;  %v1796_v61 = vpop.f32.mrf.mxu1 }
 0x20d   : > { %v605_v62 = vmax.f32 %v1794_v60, %v1796_v61 }
 0x20f   : > { %606 = vmax.xlane.f32.xlu2 %v605_v62 }
 0x214   : > { %v1800_v63 = vpop.f32.mrf.mxu0  ;;  %v1802_v0 = vpop.f32.mrf.mxu1 }
 0x215   : > { %v608_v1 = vmax.f32 %v1800_v63, %v1802_v0 }
 0x217   : > { %1383 = vmatmul.msk.bf16.gmra.mxu2 %vm352_vm2, %v341_v33  ;;  %1399 = vmatmul.msk.bf16.gmra.mxu3 %vm352_vm2, %v341_v33 }
 0x218   : > { %609 = vmax.xlane.f32.xlu2 %v608_v1 }
 0x21c   : > { %v1808_v2 = vpop.f32.mrf.mxu0  ;;  %v1810_v3 = vpop.f32.mrf.mxu1 }
 0x21d   : > { %v611_v4 = vmax.f32 %v1808_v2, %v1810_v3 }
 0x220   : > { %612 = vmax.xlane.f32.xlu2 %v611_v4 }
 0x224   : > { %v1816_v5 = vpop.f32.mrf.mxu1 }
 0x227   : > { %1384 = vmatmul.msk.bf16.gmra.mxu2 %vm352_vm2, %v343_v35  ;;  %1400 = vmatmul.msk.bf16.gmra.mxu3 %vm352_vm2, %v343_v35 }
 0x22a   : > { %v1818_v6 = vpop.f32.mrf.mxu2 }
 0x22b   : > { %v614_v7 = vmax.f32 %v1818_v6, %v1816_v5 }
 0x22c   : > { %v1822_v8 = vpop.f32.mrf.mxu1 }
 0x22d   : > { %615 = vmax.xlane.f32.xlu2 %v614_v7 }
 0x232   : > { %v1824_v9 = vpop.f32.mrf.mxu2 }
 0x233   : > { %v617_v10 = vmax.f32 %v1824_v9, %v1822_v8 }
 0x235   : > { %618 = vmax.xlane.f32.xlu2 %v617_v10 }
 0x237   : > { %1385 = vmatmul.msk.bf16.gmra.mxu2 %vm352_vm2, %v1740_v37  ;;  %1401 = vmatmul.msk.bf16.gmra.mxu3 %vm352_vm2, %v1740_v37 }
 0x23a   : > { %v1832_v11 = vpop.f32.mrf.mxu2  ;;  %v1834_v12 = vpop.f32.mrf.mxu3 }
 0x23b   : > { %v620_v13 = vmax.f32 %v1832_v11, %v1834_v12 }
 0x23d   : > { %621 = vmax.xlane.f32.xlu2 %v620_v13 }
 0x242   : > { %v1838_v14 = vpop.f32.mrf.mxu2  ;;  %v1840_v15 = vpop.f32.mrf.mxu3 }
 0x243   : > { %v623_v16 = vmax.f32 %v1838_v14, %v1840_v15 }
 0x245   : > { %624 = vmax.xlane.f32.xlu2 %v623_v16 }
 0x247   : > { %1386 = vmatmul.msk.bf16.gmra.mxu2 %vm352_vm2, %v347_v17  ;;  %1402 = vmatmul.msk.bf16.gmra.mxu3 %vm352_vm2, %v347_v17 }
 0x24a   : > { %v1846_v18 = vpop.f32.mrf.mxu2  ;;  %v1848_v19 = vpop.f32.mrf.mxu3 }
 0x24b   : > { %v586_v20 = vpop.xlane.xlu1 %585  ;;  %v626_v21 = vmax.f32 %v1846_v18, %v1848_v19 }
 0x24c   : > { %v680_v22 = vsub.f32 %v1744_v39, %v586_v20  ;;  %v681_v23 = vsub.f32 %v1746_v40, %v586_v20 }
 0x24d   : > { %627 = vmax.xlane.f32.xlu2 %v626_v21 }
 0x24e   : > { %v744_v24 = vmul.f32 1.442695, %v680_v22  ;;  %v746_v25 = vmul.f32 1.442695, %v681_v23 }
 0x250   : > { %1435 = vpow2.f32 %v744_v24 }
 0x251   : > { %1437 = vpow2.f32 %v746_v25 }
 0x252   : > { %v1854_v26 = vpop.f32.mrf.mxu2  ;;  %v1856_v27 = vpop.f32.mrf.mxu3 }
 0x253   : > { %v589_v28 = vpop.xlane.xlu1 %588  ;;  %v629_v29 = vmax.f32 %v1854_v26, %v1856_v27 }
 0x254   : > { %v682_v30 = vsub.f32 %v1752_v42, %v589_v28  ;;  %v683_v31 = vsub.f32 %v1754_v43, %v589_v28 }
 0x255   : > { %630 = vmax.xlane.f32.xlu2 %v629_v29 }
 0x256   : > { %v748_v32 = vmul.f32 1.442695, %v682_v30  ;;  %v750_v33 = vmul.f32 1.442695, %v683_v31  ;;  %v1862_v34 = vpop.eup %1435 }
 0x257   : > { %v1864_v35 = vpop.eup %1437 }
 0x258   : > { %1439 = vpow2.f32 %v748_v32  ;;  %v872_v39 = vadd.f32 %v1864_v35, %v1862_v34 }
 0x259   : > { %1441 = vpow2.f32 %v750_v33 }
 0x25a   : > { %v1866_v36 = vpop.f32.mrf.mxu2  ;;  %v1868_v37 = vpop.f32.mrf.mxu3 }
 0x25b   : > { %v592_v38 = vpop.xlane.xlu1 %591 }
 0x25c   : > { %v684_v41 = vsub.f32 %v1758_v45, %v592_v38  ;;  %v685_v43 = vsub.f32 %v1760_v46, %v592_v38  ;;  %v632_v46 = vmax.f32 %v1866_v36, %v1868_v37 }
 0x25d   : > { %873 = vadd.xlane.f32.xlu2 %v872_v39 }
 0x25e   : > { %v1872_v40 = vpop.eup %1439  ;;  %v752_v53 = vmul.f32 1.442695, %v684_v41  ;;  %v754_v45 = vmul.f32 1.442695, %v685_v43 }
 0x25f   : > { %v1875_v42 = vpop.eup %1441 }
 0x260   : > { %v875_v47 = vadd.f32 %v1875_v42, %v1872_v40  ;;  %1443 = vpow2.f32 %v752_v53 }
 0x261   : > { %1445 = vpow2.f32 %v754_v45 }
 0x262   : > { %876 = vadd.xlane.f32.xlu1 %v875_v47  ;;  %v1884_v56 = vpop.f32.mrf.mxu2  ;;  %v1886_v59 = vpop.f32.mrf.mxu3 }
 0x263   : > { %v595_v62 = vpop.xlane.xlu1 %594  ;;  %v635_v20 = vmax.f32 %v1884_v56, %v1886_v59 }
 0x264   : > { %v686_v1 = vsub.f32 %v1766_v48, %v595_v62  ;;  %v687_v4 = vsub.f32 %v1768_v49, %v595_v62 }
 0x265   : > { %633 = vmax.xlane.f32.xlu2 %v632_v46 }
 0x266   : > { %v756_v7 = vmul.f32 1.442695, %v686_v1  ;;  %v758_v10 = vmul.f32 1.442695, %v687_v4  ;;  %v1898_v21 = vpop.eup %1443 }
 0x267   : > { %v1900_v48 = vpop.eup %1445 }
 0x268   : > { %1447 = vpow2.f32 %v756_v7 }
 0x269   : > { %1449 = vpow2.f32 %v758_v10 }
 0x26a   : > { %v1892_v13 = vpop.f32.mrf.mxu2  ;;  %v1894_v16 = vpop.f32.mrf.mxu3 }
 0x26b   : > { %v598_v17 = vpop.xlane.xlu1 %597  ;;  %v638_v53 = vmax.f32 %v1892_v13, %v1894_v16 }
 0x26c   : > { %v688_v22 = vsub.f32 %v1772_v51, %v598_v17  ;;  %v689_v24 = vsub.f32 %v1774_v52, %v598_v17  ;;  %v878_v51 = vadd.f32 %v1900_v48, %v1898_v21 }
 0x26d   : > { %636 = vmax.xlane.f32.xlu2 %v635_v20 }
 0x26e   : > { %v1902_v49 = vpop.eup %1447  ;;  %v760_v29 = vmul.f32 1.442695, %v688_v22  ;;  %v762_v32 = vmul.f32 1.442695, %v689_v24 }
 0x26f   : > { %v1905_v23 = vpop.eup %1449 }
 0x270   : > { %1451 = vpow2.f32 %v760_v29  ;;  %v881_v22 = vadd.f32 %v1905_v23, %v1902_v49 }
 0x271   : > { %1453 = vpow2.f32 %v762_v32 }
 0x272   : > { %v1912_v30 = vpop.f32.mrf.mxu2  ;;  %v1914_v31 = vpop.f32.mrf.mxu3 }
 0x273   : > { %v601_v33 = vpop.xlane.xlu1 %600 }
 0x274   : > { %v690_v38 = vsub.f32 %v1780_v54, %v601_v33  ;;  %v691_v52 = vsub.f32 %v1782_v55, %v601_v33 }
 0x275   : > { %879 = vadd.xlane.f32.xlu2 %v878_v51 }
 0x276   : > { %v764_v39 = vmul.f32 1.442695, %v690_v38  ;;  %v766_v41 = vmul.f32 1.442695, %v691_v52  ;;  %v1926_v45 = vpop.eup %1451  ;;  %v641_v38 = vmax.f32 %v1912_v30, %v1914_v31 }
 0x277   : > { %v1928_v62 = vpop.eup %1453 }
 0x278   : > { %1455 = vpow2.f32 %v764_v39 }
 0x279   : > { %1457 = vpow2.f32 %v766_v41 }
 0x27a   : > { %v1920_v43 = vpop.f32.mrf.mxu2  ;;  %v1922_v47 = vpop.f32.mrf.mxu3 }
 0x27b   : > { %v604_v54 = vpop.xlane.xlu0 %603  ;;  %v644_v50 = vmax.f32 %v1920_v43, %v1922_v47 }
 0x27c   : > { %v693_v4 = vsub.f32 %v1788_v58, %v604_v54  ;;  %v692_v7 = vsub.f32 %v1786_v57, %v604_v54 }
 0x27d   : > { %639 = vmax.xlane.f32.xlu2 %v638_v53 }
 0x27e   : > { %v1930_v55 = vpop.eup %1455  ;;  %v770_v24 = vmul.f32 1.442695, %v693_v4  ;;  %v768_v25 = vmul.f32 1.442695, %v692_v7 }
 0x27f   : > { %v1932_v46 = vpop.eup %1457 }
 0x280   : > { %1459 = vpow2.f32 %v770_v24  ;;  %v884_v24 = vadd.f32 %v1928_v62, %v1926_v45  ;;  %v887_v44 = vadd.f32 %v1932_v46, %v1930_v55 }
 0x282   : > { %v1939_v10 = vpop.f32.mrf.mxu2  ;;  %v1941_v17 = vpop.f32.mrf.mxu3 }
 0x283   : > { %v607_v20 = vpop.xlane.xlu2 %606 }
 0x284   : > { %v695_v29 = vsub.f32 %v1796_v61, %v607_v20 }
 0x285   : > { %882 = vadd.xlane.f32.xlu2 %v881_v22 }
 0x286   : > { %v774_v32 = vmul.f32 1.442695, %v695_v29  ;;  %v1954_v52 = vpop.eup %1459 }
 0x288   : > { %1461 = vpow2.f32 %v774_v32 }
 0x289   : > { %1463 = vpow2.f32 %v768_v25 }
 0x28a   : > { %v1946_v33 = vpop.f32.mrf.mxu2  ;;  %v1948_v58 = vpop.f32.mrf.mxu3 }
 0x28b   : > { %2482 = vst [vmem:[#allocation5_spill] sm:$0xff] %v1946_v33  ;;  %v650_v51 = vmax.f32 %v1946_v33, %v1948_v58  ;;  %v610_v39 = vpop.xlane.xlu2 %609 }
 0x28c   : > { %v696_v25 = vsub.f32 %v1800_v63, %v610_v39 }
 0x28d   : > { %651 = vmax.xlane.f32.xlu1 %v650_v51  ;;  %642 = vmax.xlane.f32.xlu2 %v641_v38 }
 0x28e   : > { %v1956_v61 = vpop.eup %1461 }
 0x292   : > { %v1960_v53 = vpop.f32.mrf.mxu2  ;;  %v1962_v4 = vpop.f32.mrf.mxu3 }
 0x293   : > { %2483 = vst [vmem:[#allocation6_spill] sm:$0xff] %v1960_v53  ;;  %v653_v22 = vmax.f32 %v1960_v53, %v1962_v4  ;;  %v613_v29 = vpop.xlane.xlu2 %612 }
 0x295   : > { %654 = vmax.xlane.f32.xlu1 %v653_v22  ;;  %885 = vadd.xlane.f32.xlu2 %v884_v24 }
 0x29a   : > { %v1968_v32 = vpop.f32.mrf.mxu2  ;;  %v1970_v51 = vpop.f32.mrf.mxu3 }
 0x29b   : > { %2484 = vst [vmem:[#allocation7_spill] sm:$0xff] %v1968_v32  ;;  %v656_v38 = vmax.f32 %v1968_v32, %v1970_v51 }
 0x29c   : > { %2485 = vst [vmem:[#allocation8_spill] sm:$0xff] %v1970_v51 }
 0x29d   : > { %657 = vmax.xlane.f32.xlu1 %v656_v38  ;;  %645 = vmax.xlane.f32.xlu2 %v644_v50  ;;  %v694_v50 = vsub.f32 %v1794_v60, %v607_v20  ;;  %v697_v60 = vsub.f32 %v1802_v0, %v610_v39  ;;  %v698_v0 = vsub.f32 %v1808_v2, %v613_v29 }
 0x29e   : > { %v699_v39 = vsub.f32 %v1810_v3, %v613_v29 }
 0x2a0   : > { %v616_v28 = vpop.xlane.xlu2 %615 }
 0x2a1   : > { %v700_v3 = vsub.f32 %v1818_v6, %v616_v28  ;;  %v701_v29 = vsub.f32 %v1816_v5, %v616_v28 }
 0x2a2   : > { %v1977_v41 = vpop.f32.mrf.mxu2  ;;  %v1979_v22 = vpop.f32.mrf.mxu3 }
 0x2a3   : > { %2486 = vst [vmem:[#allocation9_spill] sm:$0xff] %v1977_v41  ;;  %v659_v24 = vmax.f32 %v1977_v41, %v1979_v22  ;;  %v786_v6 = vmul.f32 1.442695, %v701_v29 }
 0x2a4   : > { %2487 = vst [vmem:[#allocation10_spill] sm:$0xff] %v1979_v22  ;;  %v647_v22 = vmax.f32 %v1939_v10, %v1941_v17 }
 0x2a5   : > { %660 = vmax.xlane.f32.xlu1 %v659_v24  ;;  %888 = vadd.xlane.f32.xlu2 %v887_v44  ;;  %v772_v24 = vmul.f32 1.442695, %v694_v50  ;;  %v1996_v44 = vpop.eup %1463  ;;  %v776_v50 = vmul.f32 1.442695, %v696_v25 }
 0x2a7   : > { %1465 = vpow2.f32 %v772_v24 }
 0x2a8   : > { %v1985_v1 = vpop.xlane.xlu2 %618  ;;  %1467 = vpow2.f32 %v776_v50 }
 0x2a9   : > { %v703_v29 = vsub.f32 %v1822_v8, %v1985_v1 }
 0x2aa   : > { %v1988_v38 = vpop.f32.mrf.mxu2  ;;  %v1990_v57 = vpop.f32.mrf.mxu3 }
 0x2ab   : > { %2488 = vst [vmem:[#allocation11_spill] sm:$0xff] %v1988_v38  ;;  %v662_v54 = vmax.f32 %v1988_v38, %v1990_v57 }
 0x2ac   : > { %2489 = vst [vmem:[#allocation12_spill] sm:$0xff] %v1990_v57 }
 0x2ad   : > { %663 = vmax.xlane.f32.xlu1 %v662_v54  ;;  %648 = vmax.xlane.f32.xlu2 %v647_v22  ;;  %v890_v22 = vadd.f32 %v1996_v44, %v1954_v52  ;;  %v778_v54 = vmul.f32 1.442695, %v697_v60  ;;  %v2010_v38 = vpop.eup %1465  ;;  %v780_v60 = vmul.f32 1.442695, %v698_v0 }
 0x2ae   : > { %v2024_v50 = vpop.eup %1467 }
 0x2af   : > { %1469 = vpow2.f32 %v778_v54 }
 0x2b0   : > { %v1998_v7 = vpop.xlane.xlu2 %621  ;;  %1471 = vpow2.f32 %v780_v60 }
 0x2b2   : > { %v2002_v20 = vpop.f32.mrf.mxu2  ;;  %v2004_v41 = vpop.f32.mrf.mxu3 }
 0x2b3   : > { %2490 = vst [vmem:[#allocation13_spill] sm:$0xff] %v2002_v20  ;;  %v665_v57 = vmax.f32 %v2002_v20, %v2004_v41 }
 0x2b4   : > { %2491 = vst [vmem:[#allocation14_spill] sm:$0xff] %v2004_v41 }
 0x2b5   : > { %666 = vmax.xlane.f32.xlu1 %v665_v57  ;;  %891 = vadd.xlane.f32.xlu2 %v890_v22  ;;  %v893_v57 = vadd.f32 %v2010_v38, %v1956_v61  ;;  %v782_v22 = vmul.f32 1.442695, %v699_v39  ;;  %v2026_v2 = vpop.eup %1469 }
 0x2b6   : > { %v896_v39 = vadd.f32 %v2026_v2, %v2024_v50  ;;  %v2042_v60 = vpop.eup %1471 }
 0x2b7   : > { %1473 = vpow2.f32 %v782_v22  ;;  %v702_v22 = vsub.f32 %v1824_v9, %v1985_v1 }
 0x2b8   : > { %v2012_v63 = vpop.xlane.xlu2 %624 }
 0x2b9   : > { %v706_v5 = vsub.f32 %v1838_v14, %v2012_v63 }
 0x2ba   : > { %v2016_v24 = vpop.f32.mrf.mxu2  ;;  %v2018_v41 = vpop.f32.mrf.mxu3 }
 0x2bb   : > { %2492 = vst [vmem:[#allocation15_spill] sm:$0xff] %v2016_v24  ;;  %v668_v25 = vmax.f32 %v2016_v24, %v2018_v41 }
 0x2bc   : > { %2493 = vst [vmem:[#allocation16_spill] sm:$0xff] %v2018_v41 }
 0x2bd   : > { %669 = vmax.xlane.f32.xlu1 %v668_v25  ;;  %894 = vadd.xlane.f32.xlu2 %v893_v57  ;;  %v784_v57 = vmul.f32 1.442695, %v700_v3  ;;  %v2046_v28 = vpop.eup %1473 }
 0x2bf   : > { %1475 = vpow2.f32 %v784_v57  ;;  %v899_v57 = vadd.f32 %v2046_v28, %v2042_v60 }
 0x2c0   : > { %v2028_v54 = vpop.xlane.xlu2 %627  ;;  %1477 = vpow2.f32 %v786_v6 }
 0x2c1   : > { %v708_v25 = vsub.f32 %v1846_v18, %v2028_v54  ;;  %v704_v18 = vsub.f32 %v1832_v11, %v1998_v7  ;;  %v788_v11 = vmul.f32 1.442695, %v702_v22  ;;  %v705_v22 = vsub.f32 %v1834_v12, %v1998_v7 }
 0x2c2   : > { %v2032_v41 = vpop.f32.mrf.mxu2  ;;  %v2034_v20 = vpop.f32.mrf.mxu3 }
 0x2c3   : > { %2494 = vst [vmem:[#allocation17_spill] sm:$0xff] %v2032_v41  ;;  %v671_v0 = vmax.f32 %v2032_v41, %v2034_v20  ;;  %v792_v41 = vmul.f32 1.442695, %v704_v18  ;;  %v794_v7 = vmul.f32 1.442695, %v705_v22 }
 0x2c4   : > { %2495 = vst [vmem:[#allocation18_spill] sm:$0xff] %v2034_v20  ;;  %v800_v20 = vmul.f32 1.442695, %v708_v25 }
 0x2c5   : > { %672 = vmax.xlane.f32.xlu1 %v671_v0  ;;  %897 = vadd.xlane.f32.xlu2 %v896_v39  ;;  %v796_v39 = vmul.f32 1.442695, %v706_v5  ;;  %v1476_v8 = vpop.eup %1475  ;;  %v1070_v5 = vlaneseq }
 0x2c6   : > { %1479 = vpow2.f32 %v800_v20  ;;  %v2066_v1 = vpop.eup %1477 }
 0x2c8   : > { %v2050_v24 = vpop.xlane.xlu2 %630 }
 0x2c9   : > { %v710_v3 = vsub.f32 %v1854_v26, %v2050_v24  ;;  %v790_v26 = vmul.f32 1.442695, %v703_v29 }
 0x2ca   : > { %v2058_v14 = vpop.f32.mrf.mxu2  ;;  %v2060_v0 = vpop.f32.mrf.mxu3 }
 0x2cb   : > { %2496 = vst [vmem:[#allocation19_spill] sm:$0xff] %v2058_v14  ;;  %v804_v9 = vmul.f32 1.442695, %v710_v3  ;;  %v674_v25 = vmax.f32 %v2058_v14, %v2060_v0 }
 0x2cc   : > { %2497 = vst [vmem:[#allocation20_spill] sm:$0xff] %v2060_v0  ;;  %v2068_v3 = vpop.eup %1479 }
 0x2cd   : > { %1481 = vpow2.f32 %v804_v9  ;;  %675 = vmax.xlane.f32.xlu1 %v674_v25  ;;  %900 = vadd.xlane.f32.xlu2 %v899_v57  ;;  %v2083_v57 = vand.u32 127, %v1070_v5  ;;  %v707_v5 = vsub.f32 %v1840_v15, %v2012_v63 }
 0x2ce   : > { %1483 = vpow2.f32 %v796_v39  ;;  %v902_v39 = vadd.f32 %v2066_v1, %v1476_v8 }
 0x2cf   : > { %1485 = vpow2.f32 %v788_v11  ;;  %v798_v53 = vmul.f32 1.442695, %v707_v5 }
 0x2d0   : > { %v874_v6 = vpop.xlane.xlu2 %873  ;;  %1487 = vpow2.f32 %v792_v41 }
 0x2d1   : > { %1489 = vpow2.f32 %v790_v26 }
 0x2d2   : > { %v2072_v20 = vpop.f32.mrf.mxu2  ;;  %v2074_v18 = vpop.f32.mrf.mxu3  ;;  %1491 = vrcp.f32 %v874_v6  ;;  %v2088_v6 = vadd.s32 4294967288, %v2083_v57 }
 0x2d3   : > { %2498 = vst [vmem:[#allocation21_spill] sm:$0xff] %v2072_v20  ;;  %v2076_v9 = vpop.eup %1481  ;;  %v677_v29 = vmax.f32 %v2072_v20, %v2074_v18 }
 0x2d4   : > { %2499 = vst [vmem:[#allocation22_spill] sm:$0xff] %v2074_v18  ;;  %v982_v41 = vpack.c.bf16 %v2076_v9, %v2068_v3  ;;  %v1484_v25 = vpop.eup %1483 }
 0x2d5   : > { %v877_v11 = vpop.xlane.xlu1 %876  ;;  %678 = vmax.xlane.f32.xlu1 %v677_v29  ;;  %903 = vadd.xlane.f32.xlu2 %v902_v39  ;;  %v1486_v12 = vpop.eup %1485 }
 0x2d6   : > { %1493 = vrcp.f32 %v877_v11  ;;  %1190 = vmatpush.bf16.msra.mxu0 %v982_v41  ;;  %v1488_v26 = vpop.eup %1487  ;;  %v978_v11 = vpack.c.bf16 %v1486_v12, %v1476_v8 }
 0x2d7   : > { %v2085_v0 = vpop.eup %1489  ;;  %v980_v20 = vpack.c.bf16 %v1484_v25, %v1488_v26  ;;  %1495 = vpow2.f32 %v794_v7 }
 0x2d8   : > { %v634_v18 = vpop.xlane.xlu2 %633  ;;  %v1492_v14 = vpop.eup %1491  ;;  %v905_v22 = vadd.f32 %v2085_v0, %v1486_v12  ;;  %1497 = vpow2.f32 %v798_v53  ;;  %v2500_v53 = vpack.c.bf16 %v1930_v55, %v1926_v45  ;;  %v2501_v55 = vpack.c.bf16 %v1902_v49, %v1898_v21 }
 0x2d9   : > { %v712_v29 = vsub.f32 %v1866_v36, %v634_v18  ;;  %v713_v41 = vsub.f32 %v1868_v37, %v634_v18  ;;  %v1072_v51 = vperm.slane %v1492_v14, %v2083_v57  ;;  %v711_v36 = vsub.f32 %v1856_v27, %v2050_v24 }
 0x2da   : > { %1191 = vmatpush.bf16.msra.mxu0 %v980_v20  ;;  %v976_v37 = vpack.c.bf16 %v2042_v60, %v2024_v50  ;;  %v709_v18 = vsub.f32 %v1848_v19, %v2028_v54  ;;  %v974_v27 = vpack.c.bf16 %v2010_v38, %v1996_v44  ;;  %v2120_v54 = vadd.s32 4294967280, %v2083_v57 }
 0x2db   : > { %v808_v15 = vmul.f32 1.442695, %v712_v29  ;;  %v810_v20 = vmul.f32 1.442695, %v713_v41  ;;  %v806_v5 = vmul.f32 1.442695, %v711_v36 }
 0x2dc   : > { %v1494_v39 = vpop.eup %1493  ;;  %v802_v24 = vmul.f32 1.442695, %v709_v18  ;;  %v2148_v18 = vadd.s32 4294967272, %v2083_v57 }
 0x2dd   : > { %v1074_v32 = vperm.slane %v1494_v39, %v2088_v6  ;;  %906 = vadd.xlane.f32.xlu2 %v905_v22  ;;  %v1496_v63 = vpop.eup %1495  ;;  %1499 = vpow2.f32 %v808_v15 }
 0x2de   : > { %1192 = vmatpush.bf16.msra.mxu0 %v978_v11  ;;  %v908_v12 = vadd.f32 %v1496_v63, %v1488_v26  ;;  %1501 = vpow2.f32 %v810_v20 }
 0x2df   : > { %v1076_v7 = vsel %vm1075_vm3, %v1074_v32, %v1072_v51 }
 0x2e0   : > { %v637_v33 = vpop.xlane.xlu2 %636 }
 0x2e1   : > { %v714_v8 = vsub.f32 %v1884_v56, %v637_v33  ;;  %v715_v14 = vsub.f32 %v1886_v59, %v637_v33  ;;  %v1498_v56 = vpop.eup %1497 }
 0x2e2   : > { %1193 = vmatpush.bf16.msra.mxu0 %v976_v37  ;;  %v911_v38 = vadd.f32 %v1498_v56, %v1484_v25  ;;  %v2502_v37 = vpack.c.bf16 %v1872_v40, %v1862_v34 }
 0x2e3   : > { %v812_v32 = vmul.f32 1.442695, %v714_v8  ;;  %v814_v51 = vmul.f32 1.442695, %v715_v14  ;;  %v2108_v33 = vpop.eup %1499  ;;  %v981_v14 = vpack.c.bf16 %v1498_v56, %v1496_v63  ;;  %v2503_v56 = vpack.c.bf16 %v1956_v61, %v1954_v52 }
 0x2e4   : > { %v2110_v19 = vpop.eup %1501 }
 0x2e5   : > { %1503 = vpow2.f32 %v812_v32  ;;  %909 = vadd.xlane.f32.xlu2 %v908_v12  ;;  %v920_v8 = vadd.f32 %v2110_v19, %v2108_v33  ;;  %v977_v32 = vpack.c.bf16 %v2046_v28, %v2026_v2 }
 0x2e6   : > { %1505 = vpow2.f32 %v814_v51  ;;  %1194 = vmatpush.bf16.msra.mxu0 %v974_v27 }
 0x2e7   : > { %1507 = vpow2.f32 %v806_v5 }
 0x2e8   : > { %v880_v59 = vpop.xlane.xlu2 %879 }
 0x2e9   : > { %1509 = vrcp.f32 %v880_v59 }
 0x2ea   : > { %1511 = vpow2.f32 %v802_v24  ;;  %1195 = vmatpush.bf16.msra.mxu0 %v2500_v53 }
 0x2eb   : > { %v2115_v50 = vpop.eup %1503 }
 0x2ec   : > { %v2117_v44 = vpop.eup %1505  ;;  %v984_v60 = vpack.c.bf16 %v2115_v50, %v2108_v33  ;;  %v2348_v33 = vadd.s32 4294967208, %v2083_v57 }
 0x2ed   : > { %912 = vadd.xlane.f32.xlu2 %v911_v38  ;;  %v923_v26 = vadd.f32 %v2117_v44, %v2115_v50  ;;  %v985_v29 = vpack.c.bf16 %v2117_v44, %v2110_v19  ;;  %v1508_v45 = vpop.eup %1507 }
 0x2ee   : > { %1196 = vmatpush.bf16.msra.mxu0 %v2501_v55  ;;  %v917_v2 = vadd.f32 %v1508_v45, %v2076_v9  ;;  %v2505_v9 = vpack.c.bf16 %v1905_v23, %v1900_v48  ;;  %v2506_v48 = vpack.c.bf16 %v1875_v42, %v1864_v35 }
 0x2ef   : > { %v1510_v25 = vpop.eup %1509  ;;  %924 = vadd.xlane.f32.xlu1 %v923_v26 }
 0x2f0   : > { %v1512_v22 = vpop.eup %1511  ;;  %v1078_v39 = vperm.slane %v1510_v25, %v2120_v54  ;;  %v640_v41 = vpop.xlane.xlu2 %639 }
 0x2f1   : > { %v716_v11 = vsub.f32 %v1892_v13, %v640_v41  ;;  %v717_v15 = vsub.f32 %v1894_v16, %v640_v41  ;;  %v983_v36 = vpack.c.bf16 %v1508_v45, %v1512_v22  ;;  %v979_v16 = vpack.c.bf16 %v2085_v0, %v2066_v1 }
 0x2f2   : > { %v1080_v20 = vsel %vm1079_vm4, %v1078_v39, %v1076_v7  ;;  %1197 = vmatpush.bf16.msra.mxu0 %v2502_v37  ;;  %v914_v34 = vadd.f32 %v1512_v22, %v2068_v3 }
 0x2f3   : > { %v816_v21 = vmul.f32 1.442695, %v716_v11  ;;  %v818_v49 = vmul.f32 1.442695, %v717_v15 }
 0x2f5   : > { %1513 = vpow2.f32 %v816_v21  ;;  %921 = vadd.xlane.f32.xlu2 %v920_v8 }
 0x2f6   : > { %1218 = vmatpush.bf16.msrb.mxu0 %v983_v36  ;;  %1515 = vpow2.f32 %v818_v49 }
 0x2f8   : > { %v883_v13 = vpop.xlane.xlu2 %882 }
 0x2f9   : > { %1517 = vrcp.f32 %v883_v13 }
 0x2fa   : > { %1219 = vmatpush.bf16.msrb.mxu0 %v981_v14 }
 0x2fb   : > { %v2142_v7 = vpop.eup %1513 }
 0x2fc   : > { %v2145_v40 = vpop.eup %1515 }
 0x2fd   : > { %915 = vadd.xlane.f32.xlu2 %v914_v34  ;;  %v926_v63 = vadd.f32 %v2145_v40, %v2142_v7 }
 0x2fe   : > { %1220 = vmatpush.bf16.msrb.mxu0 %v979_v16 }
 0x2ff   : > { %v1518_v51 = vpop.eup %1517  ;;  %927 = vadd.xlane.f32.xlu1 %v926_v63 }
 0x300   : > { %v1082_v0 = vperm.slane %v1518_v51, %v2148_v18  ;;  %v2155_v1 = vpop.xlane.xlu1 %651  ;;  %v643_v3 = vpop.xlane.xlu2 %642 }
 0x301   : > { %v718_v12 = vsub.f32 %v1912_v30, %v643_v3  ;;  %v719_v5 = vsub.f32 %v1914_v31, %v643_v3  ;;  %v725_v59 = vsub.f32 %v1948_v58, %v2155_v1  ;;  %v2504_v30 = vpack.c.bf16 %v1932_v46, %v1928_v62 }
 0x302   : > { %1221 = vmatpush.bf16.msrb.mxu0 %v977_v32  ;;  %v1084_v27 = vsel %vm1083_vm5, %v1082_v0, %v1080_v20  ;;  %v2177_v58 = vadd.s32 4294967264, %v2083_v57 }
 0x303   : > { %v820_v24 = vmul.f32 1.442695, %v718_v12  ;;  %v822_v28 = vmul.f32 1.442695, %v719_v5  ;;  %v834_v38 = vmul.f32 1.442695, %v725_v59 }
 0x304   : > { %v2507_v12 = vld [vmem:[#allocation5_spill] sm:$0xff] }
 0x305   : > { %918 = vadd.xlane.f32.xlu2 %v917_v2  ;;  %1519 = vpow2.f32 %v820_v24  ;;  %v724_v5 = vsub.f32 %v2507_v12, %v2155_v1  ;;  %v2226_v2 = vadd.s32 4294967248, %v2083_v57 }
 0x306   : > { %1222 = vmatpush.bf16.msrb.mxu0 %v2503_v56  ;;  %1521 = vpow2.f32 %v822_v28  ;;  %v2508_v28 = vld [vmem:[#allocation6_spill] sm:$0xff] }
 0x307   : > { %v832_v56 = vmul.f32 1.442695, %v724_v5 }
 0x308   : > { %v2169_v31 = vpop.xlane.xlu1 %654  ;;  %v886_v53 = vpop.xlane.xlu2 %885 }
 0x309   : > { %v727_v52 = vsub.f32 %v1962_v4, %v2169_v31  ;;  %1523 = vrcp.f32 %v886_v53  ;;  %v726_v59 = vsub.f32 %v2508_v28, %v2169_v31  ;;  %v2245_v31 = vadd.s32 4294967240, %v2083_v57  ;;  %v2513_v28 = vld [vmem:[#allocation11_spill] sm:$0xff] }
 0x30a   : > { %1223 = vmatpush.bf16.msrb.mxu0 %v2504_v30  ;;  %1525 = vpow2.f32 %v834_v38 }
 0x30b   : > { %v838_v61 = vmul.f32 1.442695, %v727_v52  ;;  %v2179_v26 = vpop.eup %1519 }
 0x30c   : > { %v2181_v62 = vpop.eup %1521  ;;  %v986_v46 = vpack.c.bf16 %v2179_v26, %v2142_v7 }
 0x30d   : > { %1527 = vpow2.f32 %v838_v61  ;;  %v929_v4 = vadd.f32 %v2181_v62, %v2179_v26  ;;  %v987_v23 = vpack.c.bf16 %v2181_v62, %v2145_v40 }
 0x30e   : > { %1224 = vmatpush.bf16.msrb.mxu0 %v2505_v9  ;;  %v836_v9 = vmul.f32 1.442695, %v726_v59 }
 0x30f   : > { %v1524_v45 = vpop.eup %1523  ;;  %930 = vadd.xlane.f32.xlu1 %v929_v4 }
 0x310   : > { %v1086_v55 = vperm.slane %v1524_v45, %v2177_v58  ;;  %v2193_v25 = vpop.xlane.xlu1 %657  ;;  %v646_v22 = vpop.xlane.xlu2 %645 }
 0x311   : > { %v720_v39 = vsub.f32 %v1920_v43, %v646_v22  ;;  %v721_v41 = vsub.f32 %v1922_v47, %v646_v22  ;;  %v2198_v15 = vpop.eup %1525  ;;  %v2207_v43 = vadd.s32 4294967256, %v2083_v57  ;;  %v2510_v22 = vld [vmem:[#allocation8_spill] sm:$0xff] }
 0x312   : > { %1225 = vmatpush.bf16.msrb.mxu0 %v2506_v48  ;;  %v1088_v11 = vsel %vm1087_vm6, %v1086_v55, %v1084_v27  ;;  %v2509_v48 = vld [vmem:[#allocation7_spill] sm:$0xff] }
 0x313   : > { %v824_v36 = vmul.f32 1.442695, %v720_v39  ;;  %v2200_v35 = vpop.eup %1527  ;;  %v826_v42 = vmul.f32 1.442695, %v721_v41  ;;  %v728_v55 = vsub.f32 %v2509_v48, %v2193_v25  ;;  %v729_v39 = vsub.f32 %v2510_v22, %v2193_v25  ;;  %v2511_v25 = vld [vmem:[#allocation9_spill] sm:$0xff] }
 0x314   : > { %v991_v20 = vpack.c.bf16 %v2200_v35, %v2198_v15 }
 0x315   : > { %1529 = vpow2.f32 %v824_v36 }
 0x316   : > { %1531 = vpow2.f32 %v826_v42 }
 0x318   : > { %v2204_v37 = vpop.xlane.xlu1 %660  ;;  %v889_v21 = vpop.xlane.xlu2 %888 }
 0x319   : > { %1533 = vrcp.f32 %v889_v21 }
 0x31b   : > { %v2209_v47 = vpop.eup %1529 }
 0x31c   : > { %v2211_v49 = vpop.eup %1531 }
 0x31d   : > { %v932_v14 = vadd.f32 %v2211_v49, %v2209_v47 }
 0x31f   : > { %v1534_v8 = vpop.eup %1533  ;;  %933 = vadd.xlane.f32.xlu1 %v932_v14  ;;  %v842_v14 = vmul.f32 1.442695, %v729_v39 }
 0x320   : > { %v1090_v13 = vperm.slane %v1534_v8, %v2207_v43  ;;  %v2216_v16 = vpop.xlane.xlu1 %663  ;;  %v649_v34 = vpop.xlane.xlu2 %648  ;;  %v840_v8 = vmul.f32 1.442695, %v728_v55 }
 0x321   : > { %v722_v63 = vsub.f32 %v1939_v10, %v649_v34  ;;  %v723_v32 = vsub.f32 %v1941_v17, %v649_v34  ;;  %v732_v59 = vsub.f32 %v2513_v28, %v2216_v16  ;;  %v2520_v28 = vld [vmem:[#allocation14_spill] sm:$0xff] }
 0x322   : > { %v1092_v51 = vsel %vm1091_vm7, %v1090_v13, %v1088_v11 }
 0x323   : > { %v828_v0 = vmul.f32 1.442695, %v722_v63  ;;  %v830_v3 = vmul.f32 1.442695, %v723_v32  ;;  %v730_v63 = vsub.f32 %v2511_v25, %v2204_v37  ;;  %v2512_v32 = vld [vmem:[#allocation10_spill] sm:$0xff] }
 0x325   : > { %1535 = vpow2.f32 %v828_v0  ;;  %v844_v5 = vmul.f32 1.442695, %v730_v63 }
 0x326   : > { %1537 = vpow2.f32 %v830_v3 }
 0x328   : > { %v2223_v27 = vpop.xlane.xlu1 %666  ;;  %v892_v24 = vpop.xlane.xlu2 %891 }
 0x329   : > { %1539 = vrcp.f32 %v892_v24 }
 0x32a   : > { %1541 = vpow2.f32 %v832_v56 }
 0x32b   : > { %v2228_v10 = vpop.eup %1535 }
 0x32c   : > { %v2230_v17 = vpop.eup %1537 }
 0x32d   : > { %v935_v1 = vadd.f32 %v2230_v17, %v2228_v10  ;;  %v989_v53 = vpack.c.bf16 %v2230_v17, %v2211_v49 }
 0x32f   : > { %v1540_v30 = vpop.eup %1539  ;;  %936 = vadd.xlane.f32.xlu1 %v935_v1  ;;  %v2514_v1 = vld [vmem:[#allocation19_spill] sm:$0xff] }
 0x330   : > { %v1094_v38 = vperm.slane %v1540_v30, %v2226_v2  ;;  %v2239_v52 = vpop.xlane.xlu1 %669  ;;  %v895_v61 = vpop.xlane.xlu2 %894 }
 0x331   : > { %1543 = vrcp.f32 %v895_v61  ;;  %v2242_v4 = vpop.eup %1541 }
 0x332   : > { %v1096_v45 = vsel %vm1095_vm8, %v1094_v38, %v1092_v51  ;;  %1545 = vpow2.f32 %v836_v9  ;;  %v938_v11 = vadd.f32 %v2242_v4, %v2198_v15  ;;  %v731_v51 = vsub.f32 %v2512_v32, %v2204_v37  ;;  %v2515_v38 = vld [vmem:[#allocation12_spill] sm:$0xff] }
 0x333   : > { %1547 = vpow2.f32 %v840_v8  ;;  %v733_v61 = vsub.f32 %v2515_v38, %v2216_v16  ;;  %v848_v9 = vmul.f32 1.442695, %v732_v59  ;;  %v2518_v8 = vld [vmem:[#allocation21_spill] sm:$0xff]  ;;  %v735_v59 = vsub.f32 %v2520_v28, %v2223_v27  ;;  %v2522_v28 = vld [vmem:[#allocation18_spill] sm:$0xff] }
 0x334   : > { %1549 = vpow2.f32 %v842_v14  ;;  %v846_v24 = vmul.f32 1.442695, %v731_v51  ;;  %v2519_v16 = vld [vmem:[#allocation13_spill] sm:$0xff] }
 0x335   : > { %1551 = vpow2.f32 %v844_v5  ;;  %v850_v25 = vmul.f32 1.442695, %v733_v61  ;;  %v734_v32 = vsub.f32 %v2519_v16, %v2223_v27 }
 0x336   : > { %1553 = vpow2.f32 %v846_v24 }
 0x337   : > { %v1544_v41 = vpop.eup %1543  ;;  %939 = vadd.xlane.f32.xlu1 %v938_v11  ;;  %v2517_v11 = vld [vmem:[#allocation15_spill] sm:$0xff]  ;;  %1555 = vpow2.f32 %v848_v9 }
 0x338   : > { %v1098_v36 = vperm.slane %v1544_v41, %v2245_v31  ;;  %v2254_v42 = vpop.xlane.xlu1 %672  ;;  %v2256_v21 = vpop.xlane.xlu2 %897 }
 0x339   : > { %v2261_v34 = vpop.eup %1545 }
 0x33a   : > { %v2259_v13 = vsel %vm1099_vm9, %v1098_v36, %v1096_v45  ;;  %v941_v0 = vadd.f32 %v2261_v34, %v2200_v35  ;;  %v2273_v56 = vpop.eup %1547  ;;  %v2516_v45 = vld [vmem:[#allocation17_spill] sm:$0xff]  ;;  %v736_v36 = vsub.f32 %v2517_v11, %v2239_v52  ;;  %v2521_v11 = vld [vmem:[#allocation16_spill] sm:$0xff] }
 0x33b   : > { %v2277_v30 = vpop.eup %1549  ;;  %v738_v48 = vsub.f32 %v2516_v45, %v2254_v42  ;;  %v854_v45 = vmul.f32 1.442695, %v735_v59  ;;  %v739_v59 = vsub.f32 %v2522_v28, %v2254_v42  ;;  %v990_v42 = vpack.c.bf16 %v2261_v34, %v2242_v4 }
 0x33c   : > { %v944_v55 = vadd.f32 %v2277_v30, %v2273_v56  ;;  %v1552_v63 = vpop.eup %1551  ;;  %v856_v24 = vmul.f32 1.442695, %v736_v36  ;;  %v737_v36 = vsub.f32 %v2521_v11, %v2239_v52 }
 0x33d   : > { %v860_v51 = vmul.f32 1.442695, %v738_v48  ;;  %v2294_v5 = vpop.eup %1553  ;;  %v862_v11 = vmul.f32 1.442695, %v739_v59 }
 0x33e   : > { %v1556_v61 = vpop.eup %1555 }
 0x33f   : > { %942 = vadd.xlane.f32.xlu1 %v941_v0 }
 0x340   : > { %v2269_v3 = vpop.xlane.xlu1 %675  ;;  %v2271_v12 = vpop.xlane.xlu2 %900 }
 0x341   : > { %v740_v37 = vsub.f32 %v2514_v1, %v2269_v3  ;;  %v852_v1 = vmul.f32 1.442695, %v734_v32 }
 0x343   : > { %v864_v22 = vmul.f32 1.442695, %v740_v37  ;;  %v947_v37 = vadd.f32 %v2294_v5, %v1552_v63 }
 0x345   : > { %1557 = vpow2.f32 %v864_v22 }
 0x347   : > { %945 = vadd.xlane.f32.xlu1 %v944_v55 }
 0x348   : > { %v679_v39 = vpop.xlane.xlu1 %678  ;;  %v2287_v41 = vpop.xlane.xlu2 %903 }
 0x349   : > { %v742_v14 = vsub.f32 %v2518_v8, %v679_v39 }
 0x34b   : > { %v868_v0 = vmul.f32 1.442695, %v742_v14  ;;  %v2299_v9 = vpop.eup %1557 }
 0x34d   : > { %1559 = vpow2.f32 %v868_v0 }
 0x34e   : > { %1561 = vpow2.f32 %v850_v25 }
 0x34f   : > { %1563 = vpow2.f32 %v860_v51  ;;  %948 = vadd.xlane.f32.xlu1 %v947_v37  ;;  %v858_v51 = vmul.f32 1.442695, %v737_v36  ;;  %v2524_v36 = vld [vmem:[#allocation20_spill] sm:$0xff] }
 0x350   : > { %v907_v38 = vpop.xlane.xlu2 %906  ;;  %1565 = vpow2.f32 %v856_v24 }
 0x351   : > { %1567 = vpow2.f32 %v852_v1  ;;  %v2523_v1 = vld [vmem:[#allocation22_spill] sm:$0xff] }
 0x352   : > { %1569 = vpow2.f32 %v854_v45  ;;  %v743_v37 = vsub.f32 %v2523_v1, %v679_v39  ;;  %v2352_v1 = vadd.s32 4294967200, %v2083_v57 }
 0x353   : > { %v2301_v48 = vpop.eup %1559  ;;  %1571 = vpow2.f32 %v858_v51 }
 0x354   : > { %v2303_v55 = vpop.eup %1561  ;;  %v998_v22 = vpack.c.bf16 %v2301_v48, %v2299_v9  ;;  %1573 = vpow2.f32 %v862_v11  ;;  %v2357_v11 = vadd.s32 4294967192, %v2083_v57 }
 0x355   : > { %v1564_v27 = vpop.eup %1563  ;;  %v950_v14 = vadd.f32 %v2303_v55, %v1556_v61 }
 0x356   : > { %1204 = vmatpush.bf16.msra.mxu1 %v998_v22  ;;  %v1566_v8 = vpop.eup %1565  ;;  %v992_v22 = vpack.c.bf16 %v1552_v63, %v2273_v56  ;;  %v988_v56 = vpack.c.bf16 %v2228_v10, %v2209_v47 }
 0x357   : > { %v996_v16 = vpack.c.bf16 %v1564_v27, %v1566_v8  ;;  %v1568_v32 = vpop.eup %1567  ;;  %951 = vadd.xlane.f32.xlu1 %v950_v14  ;;  %v741_v14 = vsub.f32 %v2524_v36, %v2269_v3 }
 0x358   : > { %v910_v25 = vpop.xlane.xlu2 %909  ;;  %v2310_v0 = vpop.eup %1569  ;;  %v994_v24 = vpack.c.bf16 %v1568_v32, %v1556_v61  ;;  %v870_v61 = vmul.f32 1.442695, %v743_v37 }
 0x359   : > { %v953_v52 = vadd.f32 %v2310_v0, %v1568_v32 }
 0x35a   : > { %1205 = vmatpush.bf16.msra.mxu1 %v996_v16  ;;  %v1572_v16 = vpop.eup %1571 }
 0x35b   : > { %v956_v39 = vadd.f32 %v1572_v16, %v1566_v8  ;;  %v1574_v3 = vpop.eup %1573 }
 0x35c   : > { %v959_v47 = vadd.f32 %v1574_v3, %v1564_v27  ;;  %v2345_v27 = vadd.s32 4294967216, %v2083_v57 }
 0x35e   : > { %1206 = vmatpush.bf16.msra.mxu1 %v994_v24  ;;  %v866_v24 = vmul.f32 1.442695, %v741_v14 }
 0x35f   : > { %954 = vadd.xlane.f32.xlu1 %v953_v52 }
 0x360   : > { %v913_v45 = vpop.xlane.xlu2 %912 }
 0x362   : > { %1207 = vmatpush.bf16.msra.mxu1 %v992_v22  ;;  %v925_v51 = vpop.xlane.xlu1 %924 }
 0x363   : > { %1575 = vrcp.f32 %v925_v51 }
 0x364   : > { %1577 = vpow2.f32 %v870_v61  ;;  %v2361_v61 = vadd.s32 4294967184, %v2083_v57 }
 0x366   : > { %1208 = vmatpush.bf16.msra.mxu1 %v990_v42 }
 0x367   : > { %957 = vadd.xlane.f32.xlu1 %v956_v39 }
 0x368   : > { %v922_v32 = vpop.xlane.xlu2 %921 }
 0x369   : > { %1579 = vrcp.f32 %v922_v32  ;;  %v1576_v63 = vpop.eup %1575 }
 0x36a   : > { %1581 = vpow2.f32 %v866_v24  ;;  %1209 = vmatpush.bf16.msra.mxu1 %v988_v56  ;;  %v2324_v28 = vpop.eup %1577  ;;  %v1134_v34 = vperm.slane %v1576_v63, %v2088_v6  ;;  %v993_v63 = vpack.c.bf16 %v2294_v5, %v2277_v30 }
 0x36b   : > { %1583 = vrcp.f32 %v2256_v21 }
 0x36c   : > { %1585 = vrcp.f32 %v2271_v12 }
 0x36d   : > { %1587 = vrcp.f32 %v2287_v41  ;;  %v2342_v41 = vadd.s32 4294967224, %v2083_v57 }
 0x36e   : > { %1210 = vmatpush.bf16.msra.mxu1 %v986_v46  ;;  %1589 = vrcp.f32 %v907_v38  ;;  %v2339_v46 = vadd.s32 4294967232, %v2083_v57 }
 0x36f   : > { %v1580_v4 = vpop.eup %1579  ;;  %1591 = vrcp.f32 %v910_v25  ;;  %960 = vadd.xlane.f32.xlu1 %v959_v47  ;;  %v997_v25 = vpack.c.bf16 %v1574_v3, %v1572_v16 }
 0x370   : > { %v1582_v10 = vpop.eup %1581  ;;  %v1133_v8 = vperm.slane %v1580_v4, %v2083_v57  ;;  %v916_v59 = vpop.xlane.xlu2 %915  ;;  %1593 = vrcp.f32 %v913_v45 }
 0x371   : > { %v999_v21 = vpack.c.bf16 %v2324_v28, %v1582_v10  ;;  %v1584_v26 = vpop.eup %1583  ;;  %v962_v37 = vadd.f32 %v1582_v10, %v2299_v9  ;;  %v995_v9 = vpack.c.bf16 %v2310_v0, %v2303_v55  ;;  %v2374_v0 = vadd.s32 4294967176, %v2083_v57 }
 0x372   : > { %v1135_v12 = vsel %vm1075_vm3, %v1134_v34, %v1133_v8  ;;  %v928_v7 = vpop.xlane.xlu1 %927  ;;  %1211 = vmatpush.bf16.msra.mxu1 %v984_v60  ;;  %v1586_v6 = vpop.eup %1585  ;;  %v1102_v60 = vperm.slane %v1584_v26, %v2339_v46  ;;  %v965_v34 = vadd.f32 %v2324_v28, %v2301_v48 }
 0x373   : > { %1595 = vrcp.f32 %v928_v7  ;;  %v1588_v38 = vpop.eup %1587  ;;  %v1106_v22 = vperm.slane %v1586_v6, %v2342_v41 }
 0x374   : > { %1597 = vrcp.f32 %v916_v59  ;;  %v1590_v52 = vpop.eup %1589  ;;  %v1110_v16 = vperm.slane %v1588_v38, %v2345_v27  ;;  %v1104_v39 = vsel %vm1103_vm10, %v1102_v60, %v2259_v13  ;;  %v1034_v59 = vld [vmem:[%s1714_s27] sm:$0xff] }
 0x375   : > { %v1592_v50 = vpop.eup %1591  ;;  %v1114_v42 = vperm.slane %v1590_v52, %v2348_v33  ;;  %v1108_v56 = vsel %vm1107_vm11, %v1106_v22, %v1104_v39 }
 0x376   : > { %1232 = vmatpush.bf16.msrb.mxu1 %v999_v21  ;;  %v1594_v45 = vpop.eup %1593  ;;  %v1118_v32 = vperm.slane %v1592_v50, %v2352_v1  ;;  %v1036_v21 = vld [vmem:[%s1714_s27 + $0x10] sm:$0xff] }
 0x377   : > { %963 = vadd.xlane.f32.xlu1 %v962_v37  ;;  %v1122_v3 = vperm.slane %v1594_v45, %v2357_v11 }
 0x378   : > { %v919_v36 = vpop.xlane.xlu2 %918 }
 0x379   : > { %v1596_v14 = vpop.eup %1595  ;;  %1599 = vrcp.f32 %v919_v36 }
 0x37a   : > { %1233 = vmatpush.bf16.msrb.mxu1 %v997_v25  ;;  %v1598_v51 = vpop.eup %1597  ;;  %v1136_v24 = vperm.slane %v1596_v14, %v2120_v54  ;;  %v1112_v54 = vsel %vm1111_vm12, %v1110_v16, %v1108_v56 }
 0x37b   : > { %v1126_v13 = vperm.slane %v1598_v51, %v2361_v61  ;;  %v1116_v4 = vsel %vm1115_vm13, %v1114_v42, %v1112_v54 }
 0x37c   : > { %v1137_v55 = vsel %vm1079_vm4, %v1136_v24, %v1135_v12  ;;  %v1120_v10 = vsel %vm1119_vm14, %v1118_v32, %v1116_v4 }
 0x37d   : > { %v1124_v57 = vsel %vm1123_vm15, %v1122_v3, %v1120_v10 }
 0x37e   : > { %1234 = vmatpush.bf16.msrb.mxu1 %v995_v9  ;;  %v1128_v12 = vsel %vm1127_vm0, %v1126_v13, %v1124_v57 }
 0x37f   : > { %v1600_v47 = vpop.eup %1599  ;;  %966 = vadd.xlane.f32.xlu1 %v965_v34  ;;  %v1035_v34 = vld [vmem:[%s1714_s27 + $0x8] sm:$0xff] }
 0x380   : > { %v1130_v8 = vperm.slane %v1600_v47, %v2374_v0 }
 0x382   : > { %1235 = vmatpush.bf16.msrb.mxu1 %v993_v63  ;;  %v1132_v30 = vsel %vm1131_vm1, %v1130_v8, %v1128_v12  ;;  %v931_v48 = vpop.xlane.xlu1 %930 }
 0x383   : > { %v1184_v5 = vmul.f32 %v1132_v30, %v1034_v59  ;;  %v1186_v7 = vmul.f32 %v1132_v30, %v1036_v21  ;;  %1601 = vrcp.f32 %v931_v48 }
 0x385   : > { %v1188_v28 = vpack.c.bf16 %v1186_v7, %v1184_v5 }
 0x386   : > { %1236 = vmatpush.bf16.msrb.mxu1 %v991_v20 }
 0x387   : > { %1198 = vmatmul.bf16.vlgmr.msra.gmra.mxu0 %v1188_v28 }
 0x389   : > { %v1602_v26 = vpop.eup %1601 }
 0x38a   : > { %1237 = vmatpush.bf16.msrb.mxu1 %v989_v53  ;;  %v1138_v6 = vperm.slane %v1602_v26, %v2148_v18 }
 0x38c   : > { %v1139_v15 = vsel %vm1083_vm5, %v1138_v6, %v1137_v55 }
 0x38e   : > { %1238 = vmatpush.bf16.msrb.mxu1 %v987_v23 }
 0x392   : > { %1239 = vmatpush.bf16.msrb.mxu1 %v985_v29  ;;  %v934_v35 = vpop.xlane.xlu1 %933 }
 0x393   : > { %1603 = vrcp.f32 %v934_v35 }
 0x397   : > { %1226 = vmatmul.bf16.vlgmr.msrb.gmra.mxu0 %v1188_v28 }
 0x399   : > { %v1604_v20 = vpop.eup %1603 }
 0x39a   : > { %v1140_v49 = vperm.slane %v1604_v20, %v2177_v58  ;;  %v1277_v20 = vstv %s1272_s8 }
 0x39c   : > { %v1141_v17 = vsel %vm1087_vm6, %v1140_v49, %v1139_v15 }
 0x3a2   : > { %v937_v53 = vpop.xlane.xlu1 %936 }
 0x3a3   : > { %1605 = vrcp.f32 %v937_v53 }
 0x3a9   : > { %v1606_v40 = vpop.eup %1605 }
 0x3aa   : > { %v1142_v62 = vperm.slane %v1606_v40, %v2207_v43  ;;  %v940_v18 = vpop.xlane.xlu1 %939 }
 0x3ab   : > { %1607 = vrcp.f32 %v940_v18 }
 0x3ac   : > { %v1143_v23 = vsel %vm1091_vm7, %v1142_v62, %v1141_v17 }
 0x3b1   : > { %v1608_v60 = vpop.eup %1607 }
 0x3b2   : > { %v943_v38 = vpop.xlane.xlu1 %942  ;;  %v1144_v22 = vperm.slane %v1608_v60, %v2226_v2 }
 0x3b3   : > { %1609 = vrcp.f32 %v943_v38 }
 0x3b4   : > { %v1145_v32 = vsel %vm1095_vm8, %v1144_v22, %v1143_v23 }
 0x3b9   : > { %v1610_v43 = vpop.eup %1609 }
 0x3ba   : > { %v946_v25 = vpop.xlane.xlu1 %945  ;;  %v1146_v14 = vperm.slane %v1610_v43, %v2245_v31 }
 0x3bb   : > { %1611 = vrcp.f32 %v946_v25 }
 0x3bc   : > { %v1147_v2 = vsel %vm1099_vm9, %v1146_v14, %v1145_v32 }
 0x3c1   : > { %v1612_v37 = vpop.eup %1611 }
 0x3c2   : > { %v949_v19 = vpop.xlane.xlu1 %948  ;;  %v1148_v9 = vperm.slane %v1612_v37, %v2339_v46 }
 0x3c3   : > { %1613 = vrcp.f32 %v949_v19 }
 0x3c4   : > { %v1149_v55 = vsel %vm1103_vm10, %v1148_v9, %v1147_v2 }
 0x3c9   : > { %v1614_v45 = vpop.eup %1613 }
 0x3ca   : > { %v952_v44 = vpop.xlane.xlu1 %951  ;;  %v1150_v42 = vperm.slane %v1614_v45, %v2342_v41 }
 0x3cb   : > { %1615 = vrcp.f32 %v952_v44 }
 0x3cc   : > { %v1151_v41 = vsel %vm1107_vm11, %v1150_v42, %v1149_v55 }
 0x3d1   : > { %v1616_v36 = vpop.eup %1615 }
 0x3d2   : > { %v955_v29 = vpop.xlane.xlu1 %954  ;;  %v1152_v56 = vperm.slane %v1616_v36, %v2345_v27 }
 0x3d3   : > { %1617 = vrcp.f32 %v955_v29 }
 0x3d4   : > { %v1153_v13 = vsel %vm1111_vm12, %v1152_v56, %v1151_v41 }
 0x3d9   : > { %v1618_v16 = vpop.eup %1617 }
 0x3da   : > { %v958_v52 = vpop.xlane.xlu1 %957  ;;  %v1154_v31 = vperm.slane %v1618_v16, %v2348_v33 }
 0x3db   : > { %1619 = vrcp.f32 %v958_v52 }
 0x3dc   : > { %v1155_v63 = vsel %vm1115_vm13, %v1154_v31, %v1153_v13 }
 0x3e1   : > { %v1620_v51 = vpop.eup %1619 }
 0x3e2   : > { %v961_v50 = vpop.xlane.xlu1 %960  ;;  %v1156_v46 = vperm.slane %v1620_v51, %v2352_v1  ;;  %v1037_v1 = vld [vmem:[%s1714_s27 + $0x18] sm:$0xff] }
 0x3e3   : > { %1621 = vrcp.f32 %v961_v50 }
 0x3e4   : > { %v1157_v47 = vsel %vm1119_vm14, %v1156_v46, %v1155_v63 }
 0x3e9   : > { %v1622_v39 = vpop.eup %1621 }
 0x3ea   : > { %v964_v58 = vpop.xlane.xlu1 %963  ;;  %v1158_v54 = vperm.slane %v1622_v39, %v2357_v11 }
 0x3eb   : > { %1623 = vrcp.f32 %v964_v58 }
 0x3ec   : > { %v1159_v33 = vsel %vm1123_vm15, %v1158_v54, %v1157_v47 }
 0x3f1   : > { %v1624_v3 = vpop.eup %1623 }
 0x3f2   : > { %v967_v24 = vpop.xlane.xlu1 %966  ;;  %v1160_v27 = vperm.slane %v1624_v3, %v2361_v61 }
 0x3f3   : > { %1625 = vrcp.f32 %v967_v24 }
 0x3f4   : > { %v1161_v57 = vsel %vm1127_vm0, %v1160_v27, %v1159_v33 }
 0x3f9   : > { %v1626_v4 = vpop.eup %1625 }
 0x3fa   : > { %v1162_v10 = vperm.slane %v1626_v4, %v2374_v0 }
 0x3fc   : > { %v1163_v11 = vsel %vm1131_vm1, %v1162_v10, %v1161_v57 }
 0x3fd   : > { %v1185_v8 = vmul.f32 %v1163_v11, %v1035_v34  ;;  %v1187_v59 = vmul.f32 %v1163_v11, %v1037_v1 }
 0x3ff   : > { %v1189_v21 = vpack.c.bf16 %v1187_v59, %v1185_v8 }
 0x401   : > { %1212 = vmatmul.bf16.vlgmr.msra.gmra.mxu1 %v1189_v21 }
 0x404   : > { %v1199_v61 = vpop.f32.mrf.mxu0 }
 0x40c   : > { %v1201_v30 = vpop.f32.mrf.mxu0 }
 0x411   : > { %1240 = vmatmul.bf16.vlgmr.msrb.gmra.mxu1 %v1189_v21 }
 0x414   : > { %v1227_v48 = vpop.f32.mrf.mxu0 }
 0x41c   : > { %v1229_v6 = vpop.f32.mrf.mxu0 }
 0x47e   : > { %v1213_v0 = vpop.f32.mrf.mxu1 }
 0x47f   : > { %v1214_v12 = vadd.f32 %v1213_v0, %v1199_v61 }
 0x481   : > { %1249 = vst [vmem:[%s2435_s7] sm:$0xff] %v1214_v12  ;;  %v1278_v49 = vmul.f32 %v1277_v20, %v1214_v12 }
 0x486   : > { %v1215_v5 = vpop.f32.mrf.mxu1 }
 0x487   : > { %v1216_v7 = vadd.f32 %v1215_v5, %v1201_v30 }
 0x489   : > { %1251 = vst [vmem:[%s2435_s7 + $0x10] sm:$0xff] %v1216_v7  ;;  %v1280_v17 = vmul.f32 %v1277_v20, %v1216_v7 }
 0x48e   : > { %v1241_v28 = vpop.f32.mrf.mxu1 }
 0x48f   : > { %v1242_v26 = vadd.f32 %v1241_v28, %v1227_v48 }
 0x491   : > { %1250 = vst [vmem:[%s2435_s7 + $0x8] sm:$0xff] %v1242_v26  ;;  %v1279_v53 = vmul.f32 %v1277_v20, %v1242_v26 }
 0x496   : > { %v1243_v15 = vpop.f32.mrf.mxu1 }
 0x497   : > { %v1244_v35 = vadd.f32 %v1243_v15, %v1229_v6 }
 0x499   : > { %1252 = vst [vmem:[%s2435_s7 + $0x18] sm:$0xff] %v1244_v35  ;;  %v1281_v40 = vmul.f32 %v1277_v20, %v1244_v35 }
 0x4a0   : > { %v1282_v62 = vld [vmem:[%s1714_s27] sm:$0xff]  ;;  %v1283_v18 = vld [vmem:[%s1714_s27 + $0x8] sm:$0xff]  ;;  %v1284_v23 = vld [vmem:[%s1714_s27 + $0x10] sm:$0xff] }
 0x4a1   : > { %v1285_v38 = vld [vmem:[%s1714_s27 + $0x18] sm:$0xff]  ;;  %v1286_v25 = vadd.f32 %v1282_v62, %v1278_v49  ;;  %v1287_v19 = vadd.f32 %v1283_v18, %v1279_v53  ;;  %v1288_v44 = vadd.f32 %v1284_v23, %v1280_v17 }
 0x4a2   : > { %v1289_v29 = vadd.f32 %v1285_v38, %v1281_v40 }
 0x4a3   : > { %1290 = vst [vmem:[%s2435_s7] sm:$0xff] %v1286_v25 }
 0x4a4   : > { %1291 = vst [vmem:[%s2435_s7 + $0x8] sm:$0xff] %v1287_v19 }
 0x4a5   : > { %1292 = vst [vmem:[%s2435_s7 + $0x10] sm:$0xff] %v1288_v44 }
 0x4a6   : > { %1293 = vst [vmem:[%s2435_s7 + $0x18] sm:$0xff] %v1289_v29 }
 0x4a7 PF: > { %s16_s22 = sadd.s32 1, %s1649_s22   ;;  %s2525_s20 = smov %s1645_s21 }
 0x4a8   : > { %p13_p5 = scmp.ge.s32.totalorder %s16_s22, 4   ;;  %s2526_s21 = smov %s2528_s3 }
 0x4aa   :  { %15 = sbr.rel (!%p13_p5) target bundleno = 2 (0x2), region = 89 }

</bundles_post_ra>
